<compile_context>
chip_gen: v7x
topology: tpu7x:2x2x1
jax: 0.10.0
libtpu: 0.0.40
codegen_flags: <defaults>
</compile_context>

<pallas_src>
import jax
import jax.numpy as jnp
from jax.experimental import pallas as pl
from jax.experimental.pallas import tpu as pltpu


def _bottleneck_kernel(x_ref,               # (1, TILE_H, W, Cin)  bf16 main tile rows
                       xup_ref, xdn_ref,    # (1, 1, W, Cin)       bf16 halo rows (clamped at border)
                       w1_ref, b1_ref,      # (Cin, P) bf16 / (1, P) f32   conv1 + folded BN1
                       w2_ref, b2_ref,      # (9, P, P) bf16 / (1, P) f32  conv2 taps (ky*3+kx, in, out)
                       w3_ref, b3_ref,      # (P, 4P) bf16 / (1, 4P) f32   conv3 + folded BN3
                       o_ref,               # (1, TILE_H, W, 4P)   f32 output tile
                       y1_ref):             # ((TILE_H+2)*W, P)    f32 scratch: conv1 rows + 1-row halo
    _, TILE_H, W, Cin = x_ref.shape
    P = w1_ref.shape[1]
    WL = TILE_H * W              # flattened rows of one output tile (matmul M)
    TOT = (TILE_H + 2) * W       # flattened rows of the halo'd conv1 scratch

    t = pl.program_id(1)
    n_tiles = pl.num_programs(1)

    def conv1(rows):             # (R, Cin) bf16 -> (R, P) f32 with folded BN + ReLU
        y = jnp.dot(rows, w1_ref[...], preferred_element_type=jnp.float32)
        return jnp.maximum(y + b1_ref[...], 0.0)

    # ---- stage 1: 1x1 conv for tile rows + 1-row halo (recompute; zero at image border) ----
    x_flat = x_ref[...].reshape(WL, Cin)                                 # bf16
    y1_ref[pl.ds(W, WL), :] = conv1(x_flat)

    @pl.when(t > 0)
    def _():
        y1_ref[pl.ds(0, W), :] = conv1(xup_ref[...].reshape(W, Cin))

    @pl.when(t == 0)
    def _():
        y1_ref[pl.ds(0, W), :] = jnp.zeros((W, P), jnp.float32)

    @pl.when(t < n_tiles - 1)
    def _():
        y1_ref[pl.ds((TILE_H + 1) * W, W), :] = conv1(xdn_ref[...].reshape(W, Cin))

    @pl.when(t == n_tiles - 1)
    def _():
        y1_ref[pl.ds((TILE_H + 1) * W, W), :] = jnp.zeros((W, P), jnp.float32)

    # ---- stage 2: 3x3 conv (stride 1, pad 1) as 9 tap matmuls on the flat slab ----
    y1 = y1_ref[...]                                                      # (TOT, P) f32
    col = jax.lax.broadcasted_iota(jnp.int32, (TOT, P), 0) % W
    # west/east = column shifts produced once per tile (XLU roll), masked at the W edges.
    west = jnp.where(col >= 1, pltpu.roll(y1, 1, 0), 0.0).astype(jnp.bfloat16)            # x[.., w-1]
    east = jnp.where(col <= W - 2, pltpu.roll(y1, TOT - 1, 0), 0.0).astype(jnp.bfloat16)  # x[.., w+1]
    cent = y1.astype(jnp.bfloat16)

    acc = None
    for ky in range(3):                       # static unroll; all tap slices are aligned
        b = ky * W
        for kx, tap in ((0, west), (1, cent), (2, east)):
            part = jnp.dot(tap[b:b + WL], w2_ref[ky * 3 + kx],
                           preferred_element_type=jnp.float32)
            acc = part if acc is None else acc + part
    y2 = jnp.maximum(acc + b2_ref[...], 0.0).astype(jnp.bfloat16)

    # ---- stage 3: 1x1 conv + folded BN3 + residual add + ReLU ----
    y3 = jnp.dot(y2, w3_ref[...], preferred_element_type=jnp.float32) + b3_ref[...]
    out = jnp.maximum(y3 + x_flat.astype(jnp.float32), 0.0)               # identity (Cin == 4P)
    o_ref[...] = out.reshape(o_ref.shape).astype(o_ref.dtype)


def _pick_tile_h(H, W, target_rows=1024):
    """Largest divisor of H with TILE_H * W <= target_rows (MXU M dimension)."""
    tile = 1
    for cand in range(1, H + 1):
        if H % cand == 0 and cand * W <= target_rows:
            tile = cand
    return tile


def bottleneck_forward_nhwc(x_nhwc, kparams, *, tile_h=None):
    """x_nhwc: (N, H, W, Cin), Cin == 4*planes (downsample=None). Returns (N, H, W, 4*planes) f32."""
    w1, b1, w2, b2, w3, b3 = kparams
    N, H, W, Cin = x_nhwc.shape
    P = w1.shape[1]
    assert Cin == 4 * P, "identity shortcut (downsample=None) needs inplanes == planes * expansion"
    if tile_h is None:
        tile_h = _pick_tile_h(H, W)
    assert H % tile_h == 0
    n_tiles = H // tile_h

    x = x_nhwc.astype(jnp.bfloat16)   # bf16 activations into the kernel (halves HBM read traffic)

    flops = 2 * N * H * W * (Cin * P + 9 * P * P + P * 4 * P)
    bytes_accessed = int(N * (H + 2 * n_tiles) * W * Cin * 2          # tile rows + halo rows (bf16)
                         + N * H * W * 4 * P * 4                       # f32 output
                         + sum(a.size * a.dtype.itemsize for a in (w1, b1, w2, b2, w3, b3)))

    grid_spec = pltpu.PrefetchScalarGridSpec(
        num_scalar_prefetch=0,
        grid=(N, n_tiles),
        in_specs=[
            # Main tile rows: matches the output block, so only TILE_H rows live in VMEM.
            pl.BlockSpec((1, tile_h, W, Cin), lambda n, t: (n, t, 0, 0)),
            # 1-row halos above/below the tile; clamped at the image border (the clamped
            # row is never read there — pl.when writes zeros instead).
            pl.BlockSpec((1, 1, W, Cin),
                         lambda n, t: (n, jnp.maximum(t * tile_h - 1, 0), 0, 0)),
            pl.BlockSpec((1, 1, W, Cin),
                         lambda n, t: (n, jnp.minimum(t * tile_h + tile_h, H - 1), 0, 0)),
            pl.BlockSpec(w1.shape, lambda n, t: (0, 0)),
            pl.BlockSpec(b1.shape, lambda n, t: (0, 0)),
            pl.BlockSpec(w2.shape, lambda n, t: (0, 0, 0)),
            pl.BlockSpec(b2.shape, lambda n, t: (0, 0)),
            pl.BlockSpec(w3.shape, lambda n, t: (0, 0)),
            pl.BlockSpec(b3.shape, lambda n, t: (0, 0)),
        ],
        out_specs=pl.BlockSpec((1, tile_h, W, 4 * P), lambda n, t: (n, t, 0, 0)),
        scratch_shapes=[pltpu.VMEM(((tile_h + 2) * W, P), jnp.float32)],
    )

    return pl.pallas_call(
        _bottleneck_kernel,
        out_shape=jax.ShapeDtypeStruct((N, H, W, 4 * P), jnp.float32),
        grid_spec=grid_spec,
        compiler_params=pltpu.CompilerParams(
            dimension_semantics=("parallel", "parallel")),
        cost_estimate=pl.CostEstimate(flops=flops, transcendentals=0,
                                      bytes_accessed=bytes_accessed),
    )(x, x, x, w1, b1, w2, b2, w3, b3)


def bottleneck_forward(x_nchw, kparams, *, tile_h=None):
    """PyTorch-interface wrapper (NCHW in / out).  In a real network keep activations NHWC
    end-to-end and call bottleneck_forward_nhwc directly to avoid this transpose pair."""
    x_nhwc = jnp.transpose(x_nchw, (0, 2, 3, 1))
    out = bottleneck_forward_nhwc(x_nhwc, kparams, tile_h=tile_h)
    return jnp.transpose(out, (0, 3, 1, 2))


# ----------------------------- parameter setup (deterministic, synthetic) -----------------------------
def make_torch_params(key, inplanes, planes):
    expansion = 4
    ks = jax.random.split(key, 15)
    # PyTorch conv weight layout: (out, in, kh, kw), bias=False everywhere.
    w1_t = 0.2 * jax.random.normal(ks[0], (planes, inplanes, 1, 1), jnp.float32)
    w2_t = 0.2 * jax.random.normal(ks[1], (planes, planes, 3, 3), jnp.float32)
    w3_t = 0.2 * jax.random.normal(ks[2], (planes * expansion, planes, 1, 1), jnp.float32)

    def bn(kg, kb, km, kv, c, eps=1e-5):
        gamma = 1.0 + 0.1 * jax.random.normal(kg, (c,), jnp.float32)
        beta = 0.1 * jax.random.normal(kb, (c,), jnp.float32)
        mean = 0.1 * jax.random.normal(km, (c,), jnp.float32)
        var = 1.0 + 0.1 * jax.random.uniform(kv, (c,), jnp.float32)
        scale = gamma * jax.lax.rsqrt(var + eps)
        bias = beta - mean * scale
        return scale, bias

    s1, b1 = bn(ks[3], ks[4], ks[5], ks[6], planes)
    s2, b2 = bn(ks[7], ks[8], ks[9], ks[10], planes)
    s3, b3 = bn(ks[11], ks[12], ks[13], ks[14], planes * expansion)
    return (w1_t, s1, b1, w2_t, s2, b2, w3_t, s3, b3)


def fold_kernel_params(torch_style):
    """Fold inference-mode BN scale into the conv weights; keep only a per-channel bias.
    Weights are cast to bf16 for the MXU; biases stay f32 (post-matmul math is f32)."""
    w1_t, s1, b1, w2_t, s2, b2, w3_t, s3, b3 = torch_style
    P = w1_t.shape[0]
    w1k = (w1_t[:, :, 0, 0] * s1[:, None]).T.astype(jnp.bfloat16)             # (Cin, P)
    w2_hwio = jnp.transpose(w2_t, (2, 3, 1, 0)) * s2[None, None, None, :]     # (3, 3, in, out)
    w2k = w2_hwio.reshape(9, P, P).astype(jnp.bfloat16)                       # (9, in, out)
    w3k = (w3_t[:, :, 0, 0] * s3[:, None]).T.astype(jnp.bfloat16)             # (P, 4P)
    return (w1k, b1[None, :].astype(jnp.float32),
            w2k, b2[None, :].astype(jnp.float32),
            w3k, b3[None, :].astype(jnp.float32))


# ----------------------------- numerics-matched pure-JAX reference -----------------------------
def ref_forward_nchw(x_nchw, kparams, planes):
    """Same folded-BN bf16 weights / bf16-rounded activations as the kernel, evaluated with
    plain XLA convs in f32 (HIGHEST precision)."""
    w1, b1, w2, b2, w3, b3 = kparams
    hi = jax.lax.Precision.HIGHEST
    f32 = jnp.float32
    x = jnp.transpose(x_nchw, (0, 2, 3, 1)).astype(jnp.bfloat16).astype(f32)
    y = jnp.maximum(jnp.einsum('nhwc,cp->nhwp', x, w1.astype(f32), precision=hi) + b1, 0.0)
    y = y.astype(jnp.bfloat16).astype(f32)
    w2_hwio = w2.astype(f32).reshape(3, 3, planes, planes)
    y = jax.lax.conv_general_dilated(y, w2_hwio, (1, 1), ((1, 1), (1, 1)),
                                     dimension_numbers=('NHWC', 'HWIO', 'NHWC'),
                                     precision=hi)
    y = jnp.maximum(y + b2, 0.0)
    y = y.astype(jnp.bfloat16).astype(f32)
    y = jnp.einsum('nhwp,pq->nhwq', y, w3.astype(f32), precision=hi) + b3
    y = jnp.maximum(y + x, 0.0)
    return jnp.transpose(y, (0, 3, 1, 2))


if __name__ == "__main__":
    N, planes, H, W = 2, 8, 16, 16
    inplanes = planes * 4                      # downsample=None => residual needs matching channels
    key = jax.random.PRNGKey(0)
    kx, kp = jax.random.split(key)
    x = jax.random.normal(kx, (N, inplanes, H, W), jnp.float32)

    torch_style = make_torch_params(kp, inplanes, planes)
    kparams = fold_kernel_params(torch_style)

    # tile_h=4 -> grid (2, 4): exercises the top-border, interior and bottom-border halo paths.
    out = bottleneck_forward(x, kparams, tile_h=4)
    out = jax.block_until_ready(out)
    assert out.shape == (N, planes * 4, H, W)

    ref = ref_forward_nchw(x, kparams, planes)
    max_err = float(jnp.max(jnp.abs(out - ref)))
    assert max_err < 2e-2, f"mismatch vs reference: max abs err {max_err}"
    print("KERNEL_OK")
</pallas_src>

<mosaic_0001>
module attributes {stable_mosaic.version = 11 : i64} {
  func.func @_bottleneck_kernel(%arg0: i32, %arg1: i32, %arg2: memref<1x4x16x32xbf16, #tpu.memory_space<vmem>>, %arg3: memref<1x1x16x32xbf16, #tpu.memory_space<vmem>>, %arg4: memref<1x1x16x32xbf16, #tpu.memory_space<vmem>>, %arg5: memref<32x8xbf16, #tpu.memory_space<vmem>>, %arg6: memref<1x8xf32, #tpu.memory_space<vmem>>, %arg7: memref<9x8x8xbf16, #tpu.memory_space<vmem>>, %arg8: memref<1x8xf32, #tpu.memory_space<vmem>>, %arg9: memref<8x32xbf16, #tpu.memory_space<vmem>>, %arg10: memref<1x32xf32, #tpu.memory_space<vmem>>, %arg11: memref<1x4x16x32xf32, #tpu.memory_space<vmem>>, %arg12: memref<96x8xf32, #tpu.memory_space<vmem>>) attributes {dimension_semantics = [#tpu.dimension_semantics<parallel>, #tpu.dimension_semantics<parallel>], iteration_bounds = array<i64: 2, 4>, scalar_prefetch = 0 : i64, scratch_operands = 1 : i64, tpu.core_type = #tpu.core_type<tc>, window_params = [{transform_indices = @transform_0, window_bounds = array<i64: 1, 4, 16, 32>}, {transform_indices = @transform_1, window_bounds = array<i64: 1, 1, 16, 32>}, {transform_indices = @transform_2, window_bounds = array<i64: 1, 1, 16, 32>}, {pipeline_mode = #tpu.pipeline_mode<synchronous>, transform_indices = @transform_3, window_bounds = array<i64: 32, 8>}, {pipeline_mode = #tpu.pipeline_mode<synchronous>, transform_indices = @transform_4, window_bounds = array<i64: 1, 8>}, {pipeline_mode = #tpu.pipeline_mode<synchronous>, transform_indices = @transform_5, window_bounds = array<i64: 9, 8, 8>}, {pipeline_mode = #tpu.pipeline_mode<synchronous>, transform_indices = @transform_6, window_bounds = array<i64: 1, 8>}, {pipeline_mode = #tpu.pipeline_mode<synchronous>, transform_indices = @transform_7, window_bounds = array<i64: 8, 32>}, {pipeline_mode = #tpu.pipeline_mode<synchronous>, transform_indices = @transform_8, window_bounds = array<i64: 1, 32>}, {transform_indices = @transform_9, window_bounds = array<i64: 1, 4, 16, 32>}]} {
    %c0 = arith.constant 0 : index
    %c0_0 = arith.constant 0 : index
    %c0_1 = arith.constant 0 : index
    %c0_2 = arith.constant 0 : index
    %0 = vector.load %arg2[%c0, %c0_0, %c0_1, %c0_2] : memref<1x4x16x32xbf16, #tpu.memory_space<vmem>>, vector<1x4x16x32xbf16>
    %1 = vector.shape_cast %0 : vector<1x4x16x32xbf16> to vector<64x32xbf16>
    %c0_3 = arith.constant 0 : index
    %c0_4 = arith.constant 0 : index
    %2 = vector.load %arg5[%c0_3, %c0_4] : memref<32x8xbf16, #tpu.memory_space<vmem>>, vector<32x8xbf16>
    %cst = arith.constant dense<0.000000e+00> : vector<64x8xf32>
    %3 = tpu.matmul %1, %2, %cst {dimension_numbers = #tpu.dot_dimension_numbers<[1], [0], [0], [1], [0, 0, 1, 1], [], []>} : vector<64x32xbf16>, vector<32x8xbf16>, vector<64x8xf32> -> vector<64x8xf32>
    %c0_5 = arith.constant 0 : index
    %c0_6 = arith.constant 0 : index
    %4 = vector.load %arg6[%c0_5, %c0_6] : memref<1x8xf32, #tpu.memory_space<vmem>>, vector<1x8xf32>
    %5 = vector.broadcast %4 : vector<1x8xf32> to vector<64x8xf32>
    %6 = arith.addf %3, %5 : vector<64x8xf32>
    %cst_7 = arith.constant 0.000000e+00 : f32
    %7 = vector.broadcast %cst_7 : f32 to vector<64x8xf32>
    %8 = arith.maximumf %6, %7 : vector<64x8xf32>
    %c16 = arith.constant 16 : index
    %c0_8 = arith.constant 0 : index
    %9 = vector.load %arg12[%c16, %c0_8] : memref<96x8xf32, #tpu.memory_space<vmem>>, vector<64x8xf32>
    tpu.vector_store %arg12[%c16, %c0_8], %8 {strides = array<i32>} : memref<96x8xf32, #tpu.memory_space<vmem>>, vector<64x8xf32>,
    %c0_i32 = arith.constant 0 : i32
    %10 = arith.cmpi sgt, %arg1, %c0_i32 : i32
    %11 = arith.extui %10 : i1 to i32
    %c0_i32_9 = arith.constant 0 : i32
    %12 = arith.cmpi ne, %11, %c0_i32_9 : i32
    scf.if %12 {
      %c0_66 = arith.constant 0 : index
      %c0_67 = arith.constant 0 : index
      %c0_68 = arith.constant 0 : index
      %c0_69 = arith.constant 0 : index
      %114 = vector.load %arg3[%c0_66, %c0_67, %c0_68, %c0_69] : memref<1x1x16x32xbf16, #tpu.memory_space<vmem>>, vector<1x1x16x32xbf16>
      %115 = vector.shape_cast %114 : vector<1x1x16x32xbf16> to vector<16x32xbf16>
      %c0_70 = arith.constant 0 : index
      %c0_71 = arith.constant 0 : index
      %116 = vector.load %arg5[%c0_70, %c0_71] : memref<32x8xbf16, #tpu.memory_space<vmem>>, vector<32x8xbf16>
      %cst_72 = arith.constant dense<0.000000e+00> : vector<16x8xf32>
      %117 = tpu.matmul %115, %116, %cst_72 {dimension_numbers = #tpu.dot_dimension_numbers<[1], [0], [0], [1], [0, 0, 1, 1], [], []>} : vector<16x32xbf16>, vector<32x8xbf16>, vector<16x8xf32> -> vector<16x8xf32>
      %c0_73 = arith.constant 0 : index
      %c0_74 = arith.constant 0 : index
      %118 = vector.load %arg6[%c0_73, %c0_74] : memref<1x8xf32, #tpu.memory_space<vmem>>, vector<1x8xf32>
      %119 = vector.broadcast %118 : vector<1x8xf32> to vector<16x8xf32>
      %120 = arith.addf %117, %119 : vector<16x8xf32>
      %cst_75 = arith.constant 0.000000e+00 : f32
      %121 = vector.broadcast %cst_75 : f32 to vector<16x8xf32>
      %122 = arith.maximumf %120, %121 : vector<16x8xf32>
      %c0_76 = arith.constant 0 : index
      %c0_77 = arith.constant 0 : index
      %123 = vector.load %arg12[%c0_76, %c0_77] : memref<96x8xf32, #tpu.memory_space<vmem>>, vector<16x8xf32>
      tpu.vector_store %arg12[%c0_76, %c0_77], %122 {strides = array<i32>} : memref<96x8xf32, #tpu.memory_space<vmem>>, vector<16x8xf32>,
    } else {
    }
    %c0_i32_10 = arith.constant 0 : i32
    %13 = arith.cmpi eq, %arg1, %c0_i32_10 : i32
    %14 = arith.extui %13 : i1 to i32
    %c0_i32_11 = arith.constant 0 : i32
    %15 = arith.cmpi ne, %14, %c0_i32_11 : i32
    scf.if %15 {
      %cst_66 = arith.constant 0.000000e+00 : f32
      %114 = vector.broadcast %cst_66 : f32 to vector<16x8xf32>
      %c0_67 = arith.constant 0 : index
      %c0_68 = arith.constant 0 : index
      %115 = vector.load %arg12[%c0_67, %c0_68] : memref<96x8xf32, #tpu.memory_space<vmem>>, vector<16x8xf32>
      tpu.vector_store %arg12[%c0_67, %c0_68], %114 {strides = array<i32>} : memref<96x8xf32, #tpu.memory_space<vmem>>, vector<16x8xf32>,
    } else {
    }
    %c3_i32 = arith.constant 3 : i32
    %16 = arith.cmpi slt, %arg1, %c3_i32 : i32
    %17 = arith.extui %16 : i1 to i32
    %c0_i32_12 = arith.constant 0 : i32
    %18 = arith.cmpi ne, %17, %c0_i32_12 : i32
    scf.if %18 {
      %c0_66 = arith.constant 0 : index
      %c0_67 = arith.constant 0 : index
      %c0_68 = arith.constant 0 : index
      %c0_69 = arith.constant 0 : index
      %114 = vector.load %arg4[%c0_66, %c0_67, %c0_68, %c0_69] : memref<1x1x16x32xbf16, #tpu.memory_space<vmem>>, vector<1x1x16x32xbf16>
      %115 = vector.shape_cast %114 : vector<1x1x16x32xbf16> to vector<16x32xbf16>
      %c0_70 = arith.constant 0 : index
      %c0_71 = arith.constant 0 : index
      %116 = vector.load %arg5[%c0_70, %c0_71] : memref<32x8xbf16, #tpu.memory_space<vmem>>, vector<32x8xbf16>
      %cst_72 = arith.constant dense<0.000000e+00> : vector<16x8xf32>
      %117 = tpu.matmul %115, %116, %cst_72 {dimension_numbers = #tpu.dot_dimension_numbers<[1], [0], [0], [1], [0, 0, 1, 1], [], []>} : vector<16x32xbf16>, vector<32x8xbf16>, vector<16x8xf32> -> vector<16x8xf32>
      %c0_73 = arith.constant 0 : index
      %c0_74 = arith.constant 0 : index
      %118 = vector.load %arg6[%c0_73, %c0_74] : memref<1x8xf32, #tpu.memory_space<vmem>>, vector<1x8xf32>
      %119 = vector.broadcast %118 : vector<1x8xf32> to vector<16x8xf32>
      %120 = arith.addf %117, %119 : vector<16x8xf32>
      %cst_75 = arith.constant 0.000000e+00 : f32
      %121 = vector.broadcast %cst_75 : f32 to vector<16x8xf32>
      %122 = arith.maximumf %120, %121 : vector<16x8xf32>
      %c80 = arith.constant 80 : index
      %c0_76 = arith.constant 0 : index
      %123 = vector.load %arg12[%c80, %c0_76] : memref<96x8xf32, #tpu.memory_space<vmem>>, vector<16x8xf32>
      tpu.vector_store %arg12[%c80, %c0_76], %122 {strides = array<i32>} : memref<96x8xf32, #tpu.memory_space<vmem>>, vector<16x8xf32>,
    } else {
    }
    %c3_i32_13 = arith.constant 3 : i32
    %19 = arith.cmpi eq, %arg1, %c3_i32_13 : i32
    %20 = arith.extui %19 : i1 to i32
    %c0_i32_14 = arith.constant 0 : i32
    %21 = arith.cmpi ne, %20, %c0_i32_14 : i32
    scf.if %21 {
      %cst_66 = arith.constant 0.000000e+00 : f32
      %114 = vector.broadcast %cst_66 : f32 to vector<16x8xf32>
      %c80 = arith.constant 80 : index
      %c0_67 = arith.constant 0 : index
      %115 = vector.load %arg12[%c80, %c0_67] : memref<96x8xf32, #tpu.memory_space<vmem>>, vector<16x8xf32>
      tpu.vector_store %arg12[%c80, %c0_67], %114 {strides = array<i32>} : memref<96x8xf32, #tpu.memory_space<vmem>>, vector<16x8xf32>,
    } else {
    }
    %c0_15 = arith.constant 0 : index
    %c0_16 = arith.constant 0 : index
    %22 = vector.load %arg12[%c0_15, %c0_16] : memref<96x8xf32, #tpu.memory_space<vmem>>, vector<96x8xf32>
    %23 = tpu.iota {dimensions = array<i32: 0>} : vector<96x8xi32>
    %c16_i32 = arith.constant 16 : i32
    %c0_i32_17 = arith.constant 0 : i32
    %24 = arith.cmpi eq, %c16_i32, %c0_i32_17 : i32
    %c1_i32 = arith.constant 1 : i32
    %25 = arith.select %24, %c1_i32, %c16_i32 : i32
    %26 = vector.broadcast %25 : i32 to vector<96x8xi32>
    %27 = arith.remsi %23, %26 : vector<96x8xi32>
    %c0_i32_18 = arith.constant 0 : i32
    %28 = vector.broadcast %c0_i32_18 : i32 to vector<96x8xi32>
    %29 = arith.cmpi ne, %27, %28 : vector<96x8xi32>
    %c0_i32_19 = arith.constant 0 : i32
    %30 = vector.broadcast %c0_i32_19 : i32 to vector<96x8xi32>
    %31 = arith.cmpi slt, %27, %30 : vector<96x8xi32>
    %c0_i32_20 = arith.constant 0 : i32
    %32 = arith.cmpi slt, %25, %c0_i32_20 : i32
    %33 = vector.broadcast %32 : i1 to vector<96x8xi1>
    %34 = vector.broadcast %33 : vector<96x8xi1> to vector<96x8xi1>
    %35 = arith.xori %31, %34 : vector<96x8xi1>
    %36 = arith.andi %35, %29 : vector<96x8xi1>
    %37 = vector.broadcast %25 : i32 to vector<96x8xi32>
    %38 = arith.addi %27, %37 : vector<96x8xi32>
    %39 = arith.select %36, %38, %27 : vector<96x8xi1>, vector<96x8xi32>
    %c1_i32_21 = arith.constant 1 : i32
    %40 = vector.broadcast %c1_i32_21 : i32 to vector<96x8xi32>
    %41 = arith.cmpi sge, %39, %40 : vector<96x8xi32>
    %c1_i32_22 = arith.constant 1 : i32
    %42 = tpu.dynamic_rotate %22 by %c1_i32_22 dim 0 : vector<96x8xf32>, i32 -> vector<96x8xf32>
    %cst_23 = arith.constant 0.000000e+00 : f32
    %43 = vector.broadcast %cst_23 : f32 to vector<96x8xf32>
    %44 = arith.select %41, %42, %43 : vector<96x8xi1>, vector<96x8xf32>
    %45 = arith.truncf %44 : vector<96x8xf32> to vector<96x8xbf16>
    %c14_i32 = arith.constant 14 : i32
    %46 = vector.broadcast %c14_i32 : i32 to vector<96x8xi32>
    %47 = arith.cmpi sle, %39, %46 : vector<96x8xi32>
    %c95_i32 = arith.constant 95 : i32
    %48 = tpu.dynamic_rotate %22 by %c95_i32 dim 0 : vector<96x8xf32>, i32 -> vector<96x8xf32>
    %cst_24 = arith.constant 0.000000e+00 : f32
    %49 = vector.broadcast %cst_24 : f32 to vector<96x8xf32>
    %50 = arith.select %47, %48, %49 : vector<96x8xi1>, vector<96x8xf32>
    %51 = arith.truncf %50 : vector<96x8xf32> to vector<96x8xbf16>
    %52 = arith.truncf %22 : vector<96x8xf32> to vector<96x8xbf16>
    %53 = vector.extract_strided_slice %45 {offsets = [0, 0], sizes = [64, 8], strides = [1, 1]} : vector<96x8xbf16> to vector<64x8xbf16>
    %c0_25 = arith.constant 0 : index
    %c0_26 = arith.constant 0 : index
    %c0_27 = arith.constant 0 : index
    %54 = vector.load %arg7[%c0_25, %c0_26, %c0_27] : memref<9x8x8xbf16, #tpu.memory_space<vmem>>, vector<1x8x8xbf16>
    %55 = vector.shape_cast %54 : vector<1x8x8xbf16> to vector<8x8xbf16>
    %cst_28 = arith.constant dense<0.000000e+00> : vector<64x8xf32>
    %56 = tpu.matmul %53, %55, %cst_28 {dimension_numbers = #tpu.dot_dimension_numbers<[1], [0], [0], [1], [0, 0, 1, 1], [], []>} : vector<64x8xbf16>, vector<8x8xbf16>, vector<64x8xf32> -> vector<64x8xf32>
    %57 = vector.extract_strided_slice %52 {offsets = [0, 0], sizes = [64, 8], strides = [1, 1]} : vector<96x8xbf16> to vector<64x8xbf16>
    %c1 = arith.constant 1 : index
    %c0_29 = arith.constant 0 : index
    %c0_30 = arith.constant 0 : index
    %58 = vector.load %arg7[%c1, %c0_29, %c0_30] : memref<9x8x8xbf16, #tpu.memory_space<vmem>>, vector<1x8x8xbf16>
    %59 = vector.shape_cast %58 : vector<1x8x8xbf16> to vector<8x8xbf16>
    %cst_31 = arith.constant dense<0.000000e+00> : vector<64x8xf32>
    %60 = tpu.matmul %57, %59, %cst_31 {dimension_numbers = #tpu.dot_dimension_numbers<[1], [0], [0], [1], [0, 0, 1, 1], [], []>} : vector<64x8xbf16>, vector<8x8xbf16>, vector<64x8xf32> -> vector<64x8xf32>
    %61 = arith.addf %56, %60 : vector<64x8xf32>
    %62 = vector.extract_strided_slice %51 {offsets = [0, 0], sizes = [64, 8], strides = [1, 1]} : vector<96x8xbf16> to vector<64x8xbf16>
    %c2 = arith.constant 2 : index
    %c0_32 = arith.constant 0 : index
    %c0_33 = arith.constant 0 : index
    %63 = vector.load %arg7[%c2, %c0_32, %c0_33] : memref<9x8x8xbf16, #tpu.memory_space<vmem>>, vector<1x8x8xbf16>
    %64 = vector.shape_cast %63 : vector<1x8x8xbf16> to vector<8x8xbf16>
    %cst_34 = arith.constant dense<0.000000e+00> : vector<64x8xf32>
    %65 = tpu.matmul %62, %64, %cst_34 {dimension_numbers = #tpu.dot_dimension_numbers<[1], [0], [0], [1], [0, 0, 1, 1], [], []>} : vector<64x8xbf16>, vector<8x8xbf16>, vector<64x8xf32> -> vector<64x8xf32>
    %66 = arith.addf %61, %65 : vector<64x8xf32>
    %67 = vector.extract_strided_slice %45 {offsets = [16, 0], sizes = [64, 8], strides = [1, 1]} : vector<96x8xbf16> to vector<64x8xbf16>
    %c3 = arith.constant 3 : index
    %c0_35 = arith.constant 0 : index
    %c0_36 = arith.constant 0 : index
    %68 = vector.load %arg7[%c3, %c0_35, %c0_36] : memref<9x8x8xbf16, #tpu.memory_space<vmem>>, vector<1x8x8xbf16>
    %69 = vector.shape_cast %68 : vector<1x8x8xbf16> to vector<8x8xbf16>
    %cst_37 = arith.constant dense<0.000000e+00> : vector<64x8xf32>
    %70 = tpu.matmul %67, %69, %cst_37 {dimension_numbers = #tpu.dot_dimension_numbers<[1], [0], [0], [1], [0, 0, 1, 1], [], []>} : vector<64x8xbf16>, vector<8x8xbf16>, vector<64x8xf32> -> vector<64x8xf32>
    %71 = arith.addf %66, %70 : vector<64x8xf32>
    %72 = vector.extract_strided_slice %52 {offsets = [16, 0], sizes = [64, 8], strides = [1, 1]} : vector<96x8xbf16> to vector<64x8xbf16>
    %c4 = arith.constant 4 : index
    %c0_38 = arith.constant 0 : index
    %c0_39 = arith.constant 0 : index
    %73 = vector.load %arg7[%c4, %c0_38, %c0_39] : memref<9x8x8xbf16, #tpu.memory_space<vmem>>, vector<1x8x8xbf16>
    %74 = vector.shape_cast %73 : vector<1x8x8xbf16> to vector<8x8xbf16>
    %cst_40 = arith.constant dense<0.000000e+00> : vector<64x8xf32>
    %75 = tpu.matmul %72, %74, %cst_40 {dimension_numbers = #tpu.dot_dimension_numbers<[1], [0], [0], [1], [0, 0, 1, 1], [], []>} : vector<64x8xbf16>, vector<8x8xbf16>, vector<64x8xf32> -> vector<64x8xf32>
    %76 = arith.addf %71, %75 : vector<64x8xf32>
    %77 = vector.extract_strided_slice %51 {offsets = [16, 0], sizes = [64, 8], strides = [1, 1]} : vector<96x8xbf16> to vector<64x8xbf16>
    %c5 = arith.constant 5 : index
    %c0_41 = arith.constant 0 : index
    %c0_42 = arith.constant 0 : index
    %78 = vector.load %arg7[%c5, %c0_41, %c0_42] : memref<9x8x8xbf16, #tpu.memory_space<vmem>>, vector<1x8x8xbf16>
    %79 = vector.shape_cast %78 : vector<1x8x8xbf16> to vector<8x8xbf16>
    %cst_43 = arith.constant dense<0.000000e+00> : vector<64x8xf32>
    %80 = tpu.matmul %77, %79, %cst_43 {dimension_numbers = #tpu.dot_dimension_numbers<[1], [0], [0], [1], [0, 0, 1, 1], [], []>} : vector<64x8xbf16>, vector<8x8xbf16>, vector<64x8xf32> -> vector<64x8xf32>
    %81 = arith.addf %76, %80 : vector<64x8xf32>
    %82 = vector.extract_strided_slice %45 {offsets = [32, 0], sizes = [64, 8], strides = [1, 1]} : vector<96x8xbf16> to vector<64x8xbf16>
    %c6 = arith.constant 6 : index
    %c0_44 = arith.constant 0 : index
    %c0_45 = arith.constant 0 : index
    %83 = vector.load %arg7[%c6, %c0_44, %c0_45] : memref<9x8x8xbf16, #tpu.memory_space<vmem>>, vector<1x8x8xbf16>
    %84 = vector.shape_cast %83 : vector<1x8x8xbf16> to vector<8x8xbf16>
    %cst_46 = arith.constant dense<0.000000e+00> : vector<64x8xf32>
    %85 = tpu.matmul %82, %84, %cst_46 {dimension_numbers = #tpu.dot_dimension_numbers<[1], [0], [0], [1], [0, 0, 1, 1], [], []>} : vector<64x8xbf16>, vector<8x8xbf16>, vector<64x8xf32> -> vector<64x8xf32>
    %86 = arith.addf %81, %85 : vector<64x8xf32>
    %87 = vector.extract_strided_slice %52 {offsets = [32, 0], sizes = [64, 8], strides = [1, 1]} : vector<96x8xbf16> to vector<64x8xbf16>
    %c7 = arith.constant 7 : index
    %c0_47 = arith.constant 0 : index
    %c0_48 = arith.constant 0 : index
    %88 = vector.load %arg7[%c7, %c0_47, %c0_48] : memref<9x8x8xbf16, #tpu.memory_space<vmem>>, vector<1x8x8xbf16>
    %89 = vector.shape_cast %88 : vector<1x8x8xbf16> to vector<8x8xbf16>
    %cst_49 = arith.constant dense<0.000000e+00> : vector<64x8xf32>
    %90 = tpu.matmul %87, %89, %cst_49 {dimension_numbers = #tpu.dot_dimension_numbers<[1], [0], [0], [1], [0, 0, 1, 1], [], []>} : vector<64x8xbf16>, vector<8x8xbf16>, vector<64x8xf32> -> vector<64x8xf32>
    %91 = arith.addf %86, %90 : vector<64x8xf32>
    %92 = vector.extract_strided_slice %51 {offsets = [32, 0], sizes = [64, 8], strides = [1, 1]} : vector<96x8xbf16> to vector<64x8xbf16>
    %c8 = arith.constant 8 : index
    %c0_50 = arith.constant 0 : index
    %c0_51 = arith.constant 0 : index
    %93 = vector.load %arg7[%c8, %c0_50, %c0_51] : memref<9x8x8xbf16, #tpu.memory_space<vmem>>, vector<1x8x8xbf16>
    %94 = vector.shape_cast %93 : vector<1x8x8xbf16> to vector<8x8xbf16>
    %cst_52 = arith.constant dense<0.000000e+00> : vector<64x8xf32>
    %95 = tpu.matmul %92, %94, %cst_52 {dimension_numbers = #tpu.dot_dimension_numbers<[1], [0], [0], [1], [0, 0, 1, 1], [], []>} : vector<64x8xbf16>, vector<8x8xbf16>, vector<64x8xf32> -> vector<64x8xf32>
    %96 = arith.addf %91, %95 : vector<64x8xf32>
    %c0_53 = arith.constant 0 : index
    %c0_54 = arith.constant 0 : index
    %97 = vector.load %arg8[%c0_53, %c0_54] : memref<1x8xf32, #tpu.memory_space<vmem>>, vector<1x8xf32>
    %98 = vector.broadcast %97 : vector<1x8xf32> to vector<64x8xf32>
    %99 = arith.addf %96, %98 : vector<64x8xf32>
    %cst_55 = arith.constant 0.000000e+00 : f32
    %100 = vector.broadcast %cst_55 : f32 to vector<64x8xf32>
    %101 = arith.maximumf %99, %100 : vector<64x8xf32>
    %102 = arith.truncf %101 : vector<64x8xf32> to vector<64x8xbf16>
    %c0_56 = arith.constant 0 : index
    %c0_57 = arith.constant 0 : index
    %103 = vector.load %arg9[%c0_56, %c0_57] : memref<8x32xbf16, #tpu.memory_space<vmem>>, vector<8x32xbf16>
    %cst_58 = arith.constant dense<0.000000e+00> : vector<64x32xf32>
    %104 = tpu.matmul %102, %103, %cst_58 {dimension_numbers = #tpu.dot_dimension_numbers<[1], [0], [0], [1], [0, 0, 1, 1], [], []>} : vector<64x8xbf16>, vector<8x32xbf16>, vector<64x32xf32> -> vector<64x32xf32>
    %c0_59 = arith.constant 0 : index
    %c0_60 = arith.constant 0 : index
    %105 = vector.load %arg10[%c0_59, %c0_60] : memref<1x32xf32, #tpu.memory_space<vmem>>, vector<1x32xf32>
    %106 = vector.broadcast %105 : vector<1x32xf32> to vector<64x32xf32>
    %107 = arith.addf %104, %106 : vector<64x32xf32>
    %108 = arith.extf %1 : vector<64x32xbf16> to vector<64x32xf32>
    %109 = arith.addf %107, %108 : vector<64x32xf32>
    %cst_61 = arith.constant 0.000000e+00 : f32
    %110 = vector.broadcast %cst_61 : f32 to vector<64x32xf32>
    %111 = arith.maximumf %109, %110 : vector<64x32xf32>
    %112 = vector.shape_cast %111 : vector<64x32xf32> to vector<1x4x16x32xf32>
    %c0_62 = arith.constant 0 : index
    %c0_63 = arith.constant 0 : index
    %c0_64 = arith.constant 0 : index
    %c0_65 = arith.constant 0 : index
    %113 = vector.load %arg11[%c0_62, %c0_63, %c0_64, %c0_65] : memref<1x4x16x32xf32, #tpu.memory_space<vmem>>, vector<1x4x16x32xf32>
    tpu.vector_store %arg11[%c0_62, %c0_63, %c0_64, %c0_65], %112 {strides = array<i32>} : memref<1x4x16x32xf32, #tpu.memory_space<vmem>>, vector<1x4x16x32xf32>,
    return
  }
  func.func @transform_0(%arg0: i32, %arg1: i32) -> (i32, i32, i32, i32) {
    %c0_i32 = arith.constant 0 : i32
    %c0_i32_0 = arith.constant 0 : i32
    %c0_i32_1 = arith.constant 0 : i32
    return %arg0, %arg1, %c0_i32, %c0_i32_0 : i32, i32, i32, i32
  }
  func.func @transform_1(%arg0: i32, %arg1: i32) -> (i32, i32, i32, i32) {
    %c4_i32 = arith.constant 4 : i32
    %0 = arith.muli %arg1, %c4_i32 : i32
    %c1_i32 = arith.constant 1 : i32
    %1 = arith.subi %0, %c1_i32 : i32
    %c0_i32 = arith.constant 0 : i32
    %2 = arith.maxsi %1, %c0_i32 : i32
    %c0_i32_0 = arith.constant 0 : i32
    %c0_i32_1 = arith.constant 0 : i32
    %c0_i32_2 = arith.constant 0 : i32
    return %arg0, %2, %c0_i32_0, %c0_i32_1 : i32, i32, i32, i32
  }
  func.func @transform_2(%arg0: i32, %arg1: i32) -> (i32, i32, i32, i32) {
    %c4_i32 = arith.constant 4 : i32
    %0 = arith.muli %arg1, %c4_i32 : i32
    %c4_i32_0 = arith.constant 4 : i32
    %1 = arith.addi %0, %c4_i32_0 : i32
    %c15_i32 = arith.constant 15 : i32
    %2 = arith.minsi %1, %c15_i32 : i32
    %c0_i32 = arith.constant 0 : i32
    %c0_i32_1 = arith.constant 0 : i32
    %c0_i32_2 = arith.constant 0 : i32
    return %arg0, %2, %c0_i32, %c0_i32_1 : i32, i32, i32, i32
  }
  func.func @transform_3(%arg0: i32, %arg1: i32) -> (i32, i32) {
    %c0_i32 = arith.constant 0 : i32
    %c0_i32_0 = arith.constant 0 : i32
    %c0_i32_1 = arith.constant 0 : i32
    return %c0_i32, %c0_i32_0 : i32, i32
  }
  func.func @transform_4(%arg0: i32, %arg1: i32) -> (i32, i32) {
    %c0_i32 = arith.constant 0 : i32
    %c0_i32_0 = arith.constant 0 : i32
    %c0_i32_1 = arith.constant 0 : i32
    return %c0_i32, %c0_i32_0 : i32, i32
  }
  func.func @transform_5(%arg0: i32, %arg1: i32) -> (i32, i32, i32) {
    %c0_i32 = arith.constant 0 : i32
    %c0_i32_0 = arith.constant 0 : i32
    %c0_i32_1 = arith.constant 0 : i32
    %c0_i32_2 = arith.constant 0 : i32
    return %c0_i32, %c0_i32_0, %c0_i32_1 : i32, i32, i32
  }
  func.func @transform_6(%arg0: i32, %arg1: i32) -> (i32, i32) {
    %c0_i32 = arith.constant 0 : i32
    %c0_i32_0 = arith.constant 0 : i32
    %c0_i32_1 = arith.constant 0 : i32
    return %c0_i32, %c0_i32_0 : i32, i32
  }
  func.func @transform_7(%arg0: i32, %arg1: i32) -> (i32, i32) {
    %c0_i32 = arith.constant 0 : i32
    %c0_i32_0 = arith.constant 0 : i32
    %c0_i32_1 = arith.constant 0 : i32
    return %c0_i32, %c0_i32_0 : i32, i32
  }
  func.func @transform_8(%arg0: i32, %arg1: i32) -> (i32, i32) {
    %c0_i32 = arith.constant 0 : i32
    %c0_i32_0 = arith.constant 0 : i32
    %c0_i32_1 = arith.constant 0 : i32
    return %c0_i32, %c0_i32_0 : i32, i32
  }
  func.func @transform_9(%arg0: i32, %arg1: i32) -> (i32, i32, i32, i32) {
    %c0_i32 = arith.constant 0 : i32
    %c0_i32_0 = arith.constant 0 : i32
    %c0_i32_1 = arith.constant 0 : i32
    return %arg0, %arg1, %c0_i32, %c0_i32_0 : i32, i32, i32, i32
  }
}

</mosaic_0001>

<bundles_post_ra>
// kernel: tpu_custom_call.1
= control target key start
LH: loop header
LB: loop body
LE: loop exit
PB: predicated region body
PF: predicated region fallthrough
CT: control target
= control target key end

     0   :  { %s3866_s0 = inlined_call_operand.hbm [shape: bf16[2,16,16,32], index: 0, kind: input, shape index: {}]   ;;  %s3867_s1 = inlined_call_operand.hbm [shape: bf16[2,16,16,32], index: 1, kind: input, shape index: {}]   ;;  %s3868_s2 = inlined_call_operand.hbm [shape: bf16[2,16,16,32], index: 2, kind: input, shape index: {}]   ;;  %s3869_s3 = inlined_call_operand.vmem [shape: bf16[32,8], index: 3, kind: input, shape index: {}]   ;;  %s3870_s4 = inlined_call_operand.vmem [shape: f32[1,8], index: 4, kind: input, shape index: {}]   ;;  %s3871_s5 = inlined_call_operand.vmem [shape: bf16[9,8,8], index: 5, kind: input, shape index: {}]   ;;  %s3872_s6 = inlined_call_operand.vmem [shape: f32[1,8], index: 6, kind: input, shape index: {}]   ;;  %s3873_s7 = inlined_call_operand.vmem [shape: bf16[8,32], index: 7, kind: input, shape index: {}]   ;;  %s3874_s8 = inlined_call_operand.vmem [shape: f32[1,32], index: 8, kind: input, shape index: {}]   ;;  %s3875_s9 = inlined_call_operand.hbm [shape: f32[2,16,16,32], index: 9, kind: output, shape index: {}]  }
   0x1   :  { %3902 = sst [smem:[#allocation26_spill]] %s3866_s0 }
   0x2   :  { %3903 = sst [smem:[#allocation27_spill]] %s3867_s1 }
   0x3   :  { %3904 = sst [smem:[#allocation28_spill]] %s3868_s2 }
   0x4   :  { %3905 = sst [smem:[#allocation29_spill]] %s3869_s3 }
   0x5   :  { %3906 = sst [smem:[#allocation30_spill]] %s3870_s4 }
   0x6   :  { %3907 = sst [smem:[#allocation31_spill]] %s3871_s5 }
   0x7   :  { %3908 = sst [smem:[#allocation32_spill]] %s3872_s6 }
   0x8   :  { %3909 = sst [smem:[#allocation33_spill]] %s3873_s7 }
   0x9   :  { %3910 = sst [smem:[#allocation34_spill]] %s3874_s8 }
   0xa   :  { %3911 = sst [smem:[#allocation35_spill]] %s3875_s9 }
   0xb   :  { %14 = vsyncpa [#allocation4], 0 }
   0xc   :  { %16 = vsyncpa [#allocation4 + $0x1], 0 }
   0xd   :  { %17 = vsyncpa [#allocation7], 0 }
   0xe   :  { %19 = vsyncpa [#allocation7 + $0x1], 0 }
   0xf   :  { %20 = vsyncpa [#allocation5], 0 }
  0x10   :  { %22 = vsyncpa [#allocation5 + $0x1], 0  ;;  %s2995_s30 = smov 0   ;;  %s2997_s10 = smov 0  }
  0x11   :  { %s2999_s11 = smov 0   ;;  %s3001_s12 = smov 0  }
  0x12   :  { %s3003_s13 = smov 0   ;;  %s3005_s14 = smov 0  }
  0x13   :  { %s3007_s15 = smov 0   ;;  %s3009_s16 = smov 0  }
  0x14   :  { %s3011_s17 = smov 0   ;;  %s3013_s18 = smov 0  }
  0x15   :  { %s3015_s19 = smov 0   ;;  %s3017_s20 = smov 0  }
  0x16   :  { %s3019_s21 = smov 0   ;;  %s3021_s22 = smov 0  }
  0x17 LB: > { %3912 = sst [smem:[#allocation14_spill]] %s2893_s13  ;;  %s3066_s23 = sadd.s32 4294967295, %s2929_s22   ;;  %s2929_s22 = sphi %s3021_s22, %s28_s22   ;;  %s2925_s21 = sphi %s3019_s21, %s3989_s21   ;;  %s2921_s20 = sphi %s3017_s20, %s3988_s20   ;;  %s2917_s19 = sphi %s3015_s19, %s3987_s19   ;;  %s2913_s18 = sphi %s3013_s18, %s3986_s18   ;;  %s2909_s17 = sphi %s3011_s17, %s3985_s17   ;;  %s2905_s16 = sphi %s3009_s16, %s3996_s16   ;;  %s2901_s15 = sphi %s3007_s15, %s3995_s15   ;;  %s2897_s14 = sphi %s3005_s14, %s3994_s14   ;;  %s2893_s13 = sphi %s3003_s13, %s3993_s13   ;;  %s2889_s12 = sphi %s3001_s12, %s3982_s12   ;;  %s2885_s11 = sphi %s2999_s11, %s3992_s11   ;;  %s2881_s10 = sphi %s2997_s10, %s3991_s10   ;;  %s2877_s30 = sphi %s2995_s30, %s3990_s30  }
  0x18   : > { %3913 = sst [smem:[#allocation15_spill]] %s2909_s17  ;;  %s37_s24 = sadd.s32 1, %s2921_s20 }
  0x19   : > { %3914 = sst [smem:[#allocation16_spill]] %s2913_s18  ;;  %p38_p0 = scmp.ge.s32.totalorder %s37_s24, 4 }
  0x1a   : > { %3915 = sst [smem:[#allocation17_spill]] %s2917_s19  ;;  %s40_s25 = sadd.s32 1, %s2925_s21 }
  0x1b   : > { %3916 = sst [smem:[#allocation18_spill]] %s2921_s20  ;;  %p3890_p1 = scmp.eq.s32.totalorder %s2929_s22, 0 }
  0x1c   : > { %3917 = sst [smem:[#allocation19_spill]] %s2925_s21  ;;  %p3889_p2 = scmp.eq.s32.totalorder %s3066_s23, 0 }
  0x1d   : > { %s3998_s24 = smov (%p38_p0, %s37_s24), 0  ;;  %s4000_s25 = smov (!%p38_p0, %s40_s25), %s2925_s21 }
  0x1e   : > { %3918 = sst [smem:[#allocation20_spill]] %s3998_s24  ;;  %s45_s26 = ssub.s32 %s2921_s20, %s3998_s24 }
  0x1f   : > { %s2142_s27 = sshll.u32 %s2921_s20, 2  ;;  %p42_p3 = scmp.ge.s32.totalorder %s4000_s25, 2 }
  0x20   : > { %s2143_s28 = sadd.s32 4294967295, %s2142_s27  ;;  %s2144_s29 = sshll.u32 %s3998_s24, 2 }
  0x21   : > { %p74_p4 = scmp.gt.s32.totalorder %s2143_s28, 0  ;;  %s4002_s25 = smov (%p42_p3, %s4000_s25), 0 }
  0x22   : > { %3919 = sst [smem:[#allocation21_spill]] %s4002_s25  ;;  %s3083_s9 = ssub.s32 %s2925_s21, %s4002_s25 }
  0x23   : > { %s4004_s28 = smov (!%p74_p4, %s2143_s28), 0  ;;  %3920 = sst [smem:[#allocation22_spill]] %s3083_s9 }
  0x24   : > { %s2145_s19 = sadd.s32 4294967295, %s2144_s29  ;;  %s3086_s8 = sor.u32 %s45_s26, %s3083_s9 }
  0x25   : > { %p78_p5 = scmp.gt.s32.totalorder %s2145_s19, 0  ;;  %s85_s6 = sadd.s32 1, %s2897_s14 }
  0x26   : > { %p92_p7 = scmp.ne.s32.totalorder %s2897_s14, %s2893_s13  ;;  %p98_p8 = scmp.ne.s32.totalorder %s2893_s13, %s2889_s12 }
  0x27   : > { %s4006_s19 = smov (!%p78_p5, %s2145_s19), 0  ;;  %s3094_s25 = sadd.s32 4, %s2142_s27 }
  0x28   : > { %s81_s24 = ssub.s32 %s4004_s28, %s4006_s19  ;;  %p3099_p9 = por %p92_p7, %p3890_p1 }
  0x29   : > { %s82_s7 = sor.u32 %s81_s24, %s3083_s9  ;;  %p3105_p11 = por %p98_p8, %p3889_p2 }
  0x2a   : > { %p83_p10 = scmp.eq.s32.totalorder %s82_s7, 0  ;;  %s3110_s12 = sadd.s32 4, %s2144_s29 }
  0x2b   : > { %s3922_s5 = scalar_select %p3105_p11, 1, 0 }
  0x2c   : > { %s3113_s19 = scalar_select %p83_p10, %s2897_s14, %s85_s6  }
  0x2d   : > { %3923 = sst [smem:[#allocation23_spill]] %s3922_s5  ;;  %p3888_p0 = scmp.lt.s32.totalorder %s2929_s22, 8 }
  0x2e   : > { %3924 = sst [smem:[#allocation24_spill]] %s3113_s19  ;;  %s3118_s24 = sshll.u32 %s2925_s21, 5 }
  0x2f   : > { %s354_s7 = sand.u32 1, %s2929_s22   ;;  %s356_s27 = sand.u32 1, %s2897_s14  }
  0x30   : > { %s2155_s18 = sshll.u32 %s356_s27, 3  ;;  %s2158_s4 = sshll.u32 %s4004_s28, 1 }
  0x31   : > { %s368_s3 = sadd.s32 %s2158_s4, %s3118_s24  ;;  %s358_s5 = scalar_lea.vmem [#allocation6], %s2155_s18 }
  0x32   : > { %s371_s13 = sshll.u32 %s358_s5, 4  ;;  %s2160_s2 = sshll.u32 %s368_s3, 6  ;;  %s3123_s13 = int_to_ptr.vmem [resolvable:$true] %s371_s13 }
  0x33   : > { %s3925_s1 = sld [smem:[#allocation27_spill]]  ;;  %p3134_p3 = pnand %p3888_p0, %p3099_p9 }
  0x34   : > { %s3140_s3 = scalar_lea.sflag [#allocation7], %s354_s7 }
  0x35   : > { %p2687_p8 = pneg %p3134_p3 }
  0x39   : > { %s3128_s6 = scalar_lea.hbm %s3925_s1, %s2160_s2  ;;  %s2690_s9 = scalar_lea.hbm %s3925_s1, 4096 }
  0x3a   : > { %s2685_s4 = scalar_lea.hbm %s3128_s6, 128  ;;  %p2691_p9 = scmp.lt.u32.totalorder %s3128_s6, %s3925_s1 }
  0x3b   : > { %p2686_p7 = scmp.ne.s32.totalorder %s3128_s6, %s2685_s4  ;;  %p2692_p12 = scmp.lt.u32.totalorder %s2690_s9, %s2685_s4 }
  0x3c   : > { %p2694_p2 = scmp.lt.u32.totalorder %s2685_s4, %s3128_s6 }
  0x3d   : > { %p2688_p10 = pnand %p2687_p8, %p2686_p7  ;;  %p2693_p0 = por %p2692_p12, %p2691_p9 }
  0x3f   : > { %p2689_p13 = pneg %p2688_p10  ;;  %p2695_p1 = por %p2694_p2, %p2693_p0 }
  0x41   : > { %p2696_p6 = pnand %p2695_p1, %p2689_p13 }
  0x43   : > { %2699 = shalt.err (!%p2696_p6)
}
  0x44   : > { %s2700_s26 = scalar_lea.vmem %s3123_s13, 128  ;;  %s2931_s7 = smov [#allocation6]  }
  0x45   : > { %p2701_p7 = scmp.ne.s32.totalorder %s3123_s13, %s2700_s26  ;;  %s2705_s29 = sshll.u32 %s2931_s7, 4  ;;  %s2706_s29 = int_to_ptr.vmem [resolvable:$false] %s2705_s29 }
  0x46   : > { %s2707_s2 = scalar_lea.vmem %s2706_s29, 256  ;;  %p2708_p5 = scmp.lt.s32.totalorder %s3123_s13, %s2706_s29 }
  0x47   : > { %p2703_p10 = pnand %p2701_p7, %p2687_p8  ;;  %p2709_p12 = scmp.lt.s32.totalorder %s2707_s2, %s2700_s26 }
  0x49   : > { %p2704_p4 = pneg %p2703_p10  ;;  %p2710_p9 = por %p2709_p12, %p2708_p5 }
  0x4b   : > { %p2711_p2 = pnand %p2710_p9, %p2704_p4 }
  0x4d   : > { %2714 = shalt.err (!%p2711_p2)
}
  0x4e   : > { %s3891_s4 = smov 64   ;;  %s3893_s5 = smov 4  }
  0x4f   : > { %2537 = dma.hbm_to_vmem [thread:$0]  (!%p3134_p3), %s3128_s6, 128, %s3123_s13, %s3140_s3, %s3891_s4, %s3891_s4, %s3893_s5  }
  0x50   : > { %p3927_p1 = scmp.lt.s32.totalorder %s2929_s22, 9  ;;  %p3928_p6 = scmp.ge.s32.totalorder %s2929_s22, 1 }
  0x51   : > { %s2141_s18 = sadd.s32 4294967294, %s2929_s22   ;;  %s49_s28 = sadd.s32 1, %s2909_s17 }
  0x52   : > { %p3175_p13 = pnand %p3928_p6, %p3927_p1  ;;  %p3930_p0 = scmp.eq.s32.totalorder %s3086_s8, 0 }
  0x53   : > { %p56_p4 = scmp.ne.s32.totalorder %s2909_s17, %s2905_s16  ;;  %p62_p5 = scmp.ne.s32.totalorder %s2905_s16, %s2901_s15 }
  0x54   : > { %s3184_s26 = scalar_select %p3930_p0, %s2909_s17, %s49_s28  }
  0x55   : > { %p286_p8 = scmp.eq.s32.totalorder %s3066_s23, 7  ;;  %p292_p7 = scmp.eq.s32.totalorder %s2141_s18, 7 }
  0x56   : > { %3931 = sst [smem:[#allocation25_spill]] %s3184_s26  ;;  %p3932_p10 = scmp.eq.s32.totalorder %s2929_s22, 0 }
  0x57   : > { %p3934_p3 = scmp.eq.s32.totalorder %s3066_s23, 0  ;;  %p3203_p2 = por %p286_p8, %p56_p4 }
  0x58   : > { %p3193_p12 = por %p3932_p10, %p56_p4  ;;  %p3207_p1 = por %p292_p7, %p62_p5 }
  0x59   : > { %p3199_p9 = por %p3934_p3, %p62_p5  ;;  %s330_s7 = sand.u32 1, %s2909_s17  }
  0x5a   : > { %s3936_s8 = scalar_select %p3203_p2, 1, 0 }
  0x5b   : > { %s3935_s6 = scalar_select %p3199_p9, 1, 0 }
  0x5c   : > { %s3937_s27 = scalar_select %p3207_p1, 1, 0 }
  0x5d   : > { %s2253_s29 = sshll.u32 %s2921_s20, 3  ;;  %s2150_s2 = sshll.u32 %s330_s7, 5 }
  0x5e   : > { %s341_s18 = sadd.s32 %s2253_s29, %s3118_s24  ;;  %s334_s4 = scalar_lea.vmem [#allocation3], %s2150_s2 }
  0x5f   : > { %s2154_s28 = sshll.u32 %s341_s18, 6  ;;  %s344_s5 = sshll.u32 %s334_s4, 4  ;;  %s3219_s5 = int_to_ptr.vmem [resolvable:$true] %s344_s5 }
  0x60   : > { %s3938_s0 = sld [smem:[#allocation26_spill]]  ;;  %p3939_p6 = scmp.lt.s32.totalorder %s2929_s22, 8 }
  0x61   : > { %s3229_s4 = scalar_lea.sflag [#allocation4], %s330_s7 }
  0x62   : > { %p3225_p0 = pnand %p3939_p6, %p3193_p12 }
  0x64   : > { %p2717_p5 = pneg %p3225_p0 }
  0x66   : > { %s3217_s26 = scalar_lea.hbm %s3938_s0, %s2154_s28  ;;  %s2720_s13 = scalar_lea.hbm %s3938_s0, 4096 }
  0x67   : > { %s2715_s29 = scalar_lea.hbm %s3217_s26, 512  ;;  %p2721_p10 = scmp.lt.u32.totalorder %s3217_s26, %s3938_s0 }
  0x68   : > { %p2716_p4 = scmp.ne.s32.totalorder %s3217_s26, %s2715_s29  ;;  %p2722_p12 = scmp.lt.u32.totalorder %s2720_s13, %s2715_s29 }
  0x69   : > { %p2724_p6 = scmp.lt.u32.totalorder %s2715_s29, %s3217_s26 }
  0x6a   : > { %p2718_p8 = pnand %p2717_p5, %p2716_p4  ;;  %p2723_p3 = por %p2722_p12, %p2721_p10 }
  0x6c   : > { %p2719_p7 = pneg %p2718_p8  ;;  %p2725_p1 = por %p2724_p6, %p2723_p3 }
  0x6e   : > { %p2726_p2 = pnand %p2725_p1, %p2719_p7 }
  0x70   : > { %2729 = shalt.err (!%p2726_p2)
}
  0x71   : > { %s2730_s7 = scalar_lea.vmem %s3219_s5, 512  ;;  %s2934_s28 = smov [#allocation3]  }
  0x72   : > { %p2731_p4 = scmp.ne.s32.totalorder %s3219_s5, %s2730_s7  ;;  %s2735_s1 = sshll.u32 %s2934_s28, 4  ;;  %s2736_s1 = int_to_ptr.vmem [resolvable:$false] %s2735_s1 }
  0x73   : > { %s2737_s21 = scalar_lea.vmem %s2736_s1, 1024  ;;  %p2738_p9 = scmp.lt.s32.totalorder %s3219_s5, %s2736_s1 }
  0x74   : > { %p2733_p8 = pnand %p2731_p4, %p2717_p5  ;;  %p2739_p10 = scmp.lt.s32.totalorder %s2737_s21, %s2730_s7 }
  0x76   : > { %p2734_p11 = pneg %p2733_p8  ;;  %p2740_p12 = por %p2739_p10, %p2738_p9 }
  0x78   : > { %p2741_p3 = pnand %p2740_p12, %p2734_p11 }
  0x7a   : > { %2744 = shalt.err (!%p2741_p3)
}
  0x7b   : > { %s3941_s29 = smov 4   ;;  %s3942_s13 = smov 64  }
  0x7c   : > { %s3943_s2 = sld [smem:[#allocation22_spill]]  ;;  %p3944_p11 = scmp.lt.s32.totalorder %s3094_s25, 15 }
  0x7d   : > { %2534 = dma.hbm_to_vmem [thread:$0]  (!%p3225_p0), %s3217_s26, 512, %s3219_s5, %s3229_s4, %s3942_s13, %s3942_s13, %s3941_s29  }
  0x7e   : > { %s4008_s25 = smov (!%p3944_p11, %s3094_s25), 15  ;;  %p3945_p9 = scmp.lt.s32.totalorder %s3110_s12, 15 }
  0x7f   : > { %s121_s20 = sadd.s32 1, %s2885_s11  ;;  %p128_p2 = scmp.ne.s32.totalorder %s2885_s11, %s2881_s10 }
  0x80   : > { %s4010_s12 = smov (!%p3945_p9, %s3110_s12), 15  ;;  %p134_p1 = scmp.ne.s32.totalorder %s2881_s10, %s2877_s30 }
  0x81   : > { %s117_s18 = ssub.s32 %s4008_s25, %s4010_s12  ;;  %p3946_p5 = scmp.eq.s32.totalorder %s2929_s22, 0 }
  0x82   : > { %s118_s7 = sor.u32 %s117_s18, %s3943_s2  ;;  %p3948_p4 = scmp.eq.s32.totalorder %s3066_s23, 0 }
  0x83   : > { %p3274_p7 = por %p128_p2, %p3946_p5  ;;  %p119_p6 = scmp.eq.s32.totalorder %s118_s7, 0 }
  0x84   : > { %p3280_p8 = por %p134_p1, %p3948_p4  ;;  %s383_s26 = sand.u32 1, %s2885_s11  }
  0x85   : > { %s2163_s4 = sshll.u32 %s4008_s25, 1  ;;  %s2161_s12 = sshll.u32 %s383_s26, 3 }
  0x86   : > { %s3949_s5 = scalar_select %p3280_p8, 1, 0 }
  0x87   : > { %s3286_s1 = scalar_select %p119_p6, %s2885_s11, %s121_s20  }
  0x88   : > { %s395_s21 = sadd.s32 %s2163_s4, %s3118_s24  ;;  %s3950_s0 = sld [smem:[#allocation28_spill]] }
  0x89   : > { %s2165_s30 = sshll.u32 %s395_s21, 6  ;;  %s385_s7 = scalar_lea.vmem [#allocation8], %s2161_s12 }
  0x8a   : > { %s398_s19 = sshll.u32 %s385_s7, 4  ;;  %p3951_p0 = scmp.lt.s32.totalorder %s2929_s22, 8  ;;  %s3294_s19 = int_to_ptr.vmem [resolvable:$true] %s398_s19 }
  0x8c   : > { %p3300_p10 = pnand %p3951_p0, %p3274_p7 }
  0x8e   : > { %s3292_s17 = scalar_lea.hbm %s3950_s0, %s2165_s30  ;;  %p2747_p3 = pneg %p3300_p10 }
  0x8f   : > { %s2745_s24 = scalar_lea.hbm %s3292_s17, 128  ;;  %s2750_s4 = scalar_lea.hbm %s3950_s0, 4096 }
  0x90   : > { %p2746_p12 = scmp.ne.s32.totalorder %s3292_s17, %s2745_s24  ;;  %p2751_p2 = scmp.lt.u32.totalorder %s3292_s17, %s3950_s0 }
  0x91   : > { %p2752_p1 = scmp.lt.u32.totalorder %s2750_s4, %s2745_s24  ;;  %p2754_p7 = scmp.lt.u32.totalorder %s2745_s24, %s3292_s17 }
  0x92   : > { %p2748_p11 = pnand %p2747_p3, %p2746_p12 }
  0x93   : > { %p2753_p5 = por %p2752_p1, %p2751_p2 }
  0x94   : > { %p2749_p9 = pneg %p2748_p11 }
  0x95   : > { %p2755_p6 = por %p2754_p7, %p2753_p5 }
  0x97   : > { %p2756_p4 = pnand %p2755_p6, %p2749_p9 }
  0x99   : > { %2759 = shalt.err (!%p2756_p4)
}
  0x9a   : > { %s2760_s21 = scalar_lea.vmem %s3294_s19, 128  ;;  %s2935_s30 = smov [#allocation8]  }
  0x9b   : > { %p2761_p0 = scmp.ne.s32.totalorder %s3294_s19, %s2760_s21  ;;  %s2765_s2 = sshll.u32 %s2935_s30, 4  ;;  %s2766_s2 = int_to_ptr.vmem [resolvable:$false] %s2765_s2 }
  0x9c   : > { %s2767_s18 = scalar_lea.vmem %s2766_s2, 256  ;;  %p2768_p8 = scmp.lt.s32.totalorder %s3294_s19, %s2766_s2 }
  0x9d   : > { %p2763_p12 = pnand %p2761_p0, %p2747_p3  ;;  %p2769_p2 = scmp.lt.s32.totalorder %s2767_s18, %s2760_s21 }
  0x9f   : > { %p2764_p11 = pneg %p2763_p12  ;;  %p2770_p1 = por %p2769_p2, %p2768_p8 }
  0xa1   : > { %p2771_p5 = pnand %p2770_p1, %p2764_p11 }
  0xa3   : > { %2774 = shalt.err (!%p2771_p5)
}
  0xa4   : > { %2540 = dma.hbm_to_vmem [thread:$0]  (!%p3300_p10), %s3292_s17, 128, %s3294_s19, %s3140_s3, %s3942_s13, %s3942_s13, %s3941_s29  }
  0xa5   : > { %410 = sbr.rel (%p3175_p13) target bundleno = 1448 (0x5a8), region = 56  ;;  %s3336_s7 = sand.u32 (!%p3175_p13), 1, %s2905_s16  }
  0xa6   : > { %s2167_s24 = sshll.u32 (!%p3175_p13), %s3336_s7, 5  ;;  %s413_s20 = scalar_lea.sflag (!%p3175_p13), [#allocation4], %s3336_s7 }
  0xa7   : > { %s416_s26 = scalar_lea.vmem (!%p3175_p13), [#allocation3], %s2167_s24  ;;  %p3953_p8 = scmp.ne.s32.totalorder (!%p3175_p13), %s3935_s6, 0 }
  0xac   : > { %2860 = dma.done.wait (%p3953_p8), %s413_s20, 512  }
  0xad   : > { %2862 = vsyncadd (%p3953_p8), %s413_s20, 4294966784  ;;  %s3954_s25 = sld [smem:[#allocation14_spill]]  ;;  %s3955_s17 = sld [smem:[#allocation23_spill]] }
  0xae   : > { %s421_s19 = sand.u32 1, %s3066_s23  }
  0xaf   : > { %s422_s29 = scalar_lea.sflag [#allocation7], %s421_s19 }
  0xb3   : > { %s423_s3 = sand.u32 1, %s3954_s25   ;;  %p3956_p13 = scmp.ne.s32.totalorder %s3955_s17, 0 }
  0xb4   : > { %s3346_s9 = sshll.u32 %s423_s3, 3 }
  0xb5   : > { %s425_s13 = scalar_lea.vmem [#allocation6], %s3346_s9 }
  0xb6   : > { %2864 = dma.done.wait (%p3956_p13), %s422_s29, 128  }
  0xb7   : > { %2866 = vsyncadd (%p3956_p13), %s422_s29, 4294967168  ;;  %s432_s4 = sand.u32 1, %s2881_s10   ;;  %p3957_p10 = scmp.ne.s32.totalorder %s3949_s5, 0 }
  0xb8   : > { %s3354_s6 = sshll.u32 %s432_s4, 3 }
  0xb9   : > { %s434_s28 = scalar_lea.vmem [#allocation8], %s3354_s6 }
  0xba   : > { %2868 = dma.done.wait (%p3957_p10), %s422_s29, 128  }
  0xbb   : > { %2870 = vsyncadd (%p3957_p10), %s422_s29, 4294967168  ;;  %s2170_s23 = sshll.u32 %s3336_s7, 6  ;;  %s3958_s30 = sld [smem:[#allocation29_spill]]  ;;  %v3368_v2 = vld [vmem:[%s416_s26] sm:$0xff]   ;;  %vm541_vm0 = vcmask 261120   ;;  %v3370_v3 = vld [vmem:[%s416_s26 + $0x10] sm:$0xff]  }
  0xbc   : > { %v3372_v4 = vld [vmem:[%s416_s26 + $0x8] sm:$0xff]   ;;  %v3374_v5 = vld [vmem:[%s416_s26 + $0x18] sm:$0xff]   ;;  %2321 = vmatprep.mubr.msk.bf16.mxu0 %vm541_vm0, %v3368_v2  ;;  %2325 = vmatprep.mubr.msk.bf16.mxu1 %vm541_vm0, %v3370_v3  ;;  %s3959_s20 = sld [smem:[#allocation30_spill]]  ;;  %vm627_vm1 = vcmask 64512   ;;  %s3397_s26 = scalar_lea.vmem [#allocation9], %s2170_s23 }
  0xbd   : > { %s3960_s25 = sld [smem:[#allocation16_spill]] }
  0xc1   : > { %v2669_v0 = vld [vmem:[%s3958_s30] sm:$0xff]   ;;  %v2670_v1 = vld [vmem:[%s3958_s30 + $0x8] sm:$0xff]  }
  0xc2   : > { %2317 = vmatprep.subr.bf16.mxu0 %v2669_v0  ;;  %2445 = vmatprep.subr.bf16.mxu1 %v2669_v0  ;;  %v2171_v6 = vld [vmem:[%s3959_s20] ss:$0 sm:$0xff] }
  0xc3   : > { %2318 = vmatpush3.bf16.msra.mxu0 %v2669_v0  ;;  %2447 = vmatpush3.bf16.msra.mxu1 %v2669_v0  ;;  %p2182_p3 = scmp.le.s32.totalorder %s3960_s25, 0 }
  0xc4   : > { %2319 = vmatprep.subr.bf16.mxu0 %v2670_v1  ;;  %2446 = vmatprep.subr.bf16.mxu1 %v2670_v1  ;;  %s3961_s3 = sld [smem:[#allocation29_spill]] (!%p2182_p3)  ;;  %v2936_v32 = vmov (!%p2182_p3), 0.0   ;;  %vm2937_vm2 = vmmov (!%p2182_p3), 0   ;;  %v2681_v34 = vld [vmem:[%s425_s13] sm:$0xff] (!%p2182_p3)   ;;  %s3962_s21 = sld [smem:[#allocation30_spill]] (!%p2182_p3) }
  0xc7   : > { %2320 = vmatpush3.bf16.msra.mxu0 %v2670_v1  ;;  %2448 = vmatpush3.bf16.msra.mxu1 %v2670_v1 }
  0xc8   : > { %2329 = vmatprep.subr.bf16.mxu0 (!%p2182_p3), %v2936_v32 }
  0xca   : > { %2322 = vmatmul.mubr.msk.bf16.vlgmr.msra.gmra.mrb[0].mxu0 %vm541_vm0, %v3372_v4  ;;  %2326 = vmatmul.mubr.msk.bf16.vlgmr.msra.gmra.mrb[0].mxu1 %vm541_vm0, %v3374_v5  ;;  %v2679_v31 = vld [vmem:[%s3961_s3] sm:$0xff] (!%p2182_p3)   ;;  %v2680_v33 = vld [vmem:[%s3961_s3 + $0x8] sm:$0xff] (!%p2182_p3)  }
  0xcb   : > { %2330 = vmatpush3.bf16.msra.mxu0 (!%p2182_p3), %v2679_v31  ;;  %2333 = vmatprep.mubr.msk.bf16.mxu0 (!%p2182_p3), %vm2937_vm2, %v2936_v32  ;;  %v2183_v35 = vld [vmem:[%s3962_s21] ss:$0 sm:$0xff] (!%p2182_p3) }
  0xcc   : > { %2331 = vmatprep.subr.bf16.mxu0 (!%p2182_p3), %v2936_v32 }
  0xcf   : > { %2332 = vmatpush3.bf16.msra.mxu0 (!%p2182_p3), %v2680_v33 }
 0x19d   : > { %v2323_v7 = vpop.f32.mrb[0].mxu0  ;;  %v2327_v8 = vpop.f32.mrb[0].mxu1 }
 0x19e   : > { %v597_v9 = vadd.f32 %v2323_v7, %v2171_v6  ;;  %v613_v10 = vadd.f32 %v2327_v8, %v2171_v6  ;;  %v588_v11 = vpop.f32.mrb[1].mxu0  ;;  %v604_v12 = vpop.f32.mrb[1].mxu1 }
 0x19f   : > { %v589_v13 = vadd.f32 %v2171_v6, %v588_v11  ;;  %v605_v14 = vadd.f32 %v2171_v6, %v604_v12  ;;  %v2324_v15 = vpop.f32.mrb[2].mxu0  ;;  %v2328_v16 = vpop.f32.mrb[2].mxu1  ;;  %639 = sbr.rel (%p2182_p3) target bundleno = 635 (0x27b), region = 72 }
 0x1a0   : > { %v621_v17 = vmax.f32 %v597_v9, 0.0  ;;  %v625_v18 = vmax.f32 %v613_v10, 0.0  ;;  %v600_v19 = vadd.f32 %v2324_v15, %v2171_v6  ;;  %v616_v20 = vadd.f32 %v2328_v16, %v2171_v6  ;;  %v591_v21 = vpop.f32.mrb[3].mxu0  ;;  %v607_v22 = vpop.f32.mrb[3].mxu1  ;;  %2334 = vmatmul.mubr.msk.bf16.vlgmr.msra.gmra.mrb[0].mxu0 (!%p2182_p3), %vm541_vm0, %v2681_v34 }
 0x1a1   : > { %v619_v23 = vmax.f32 %v589_v13, 0.0  ;;  %v623_v24 = vmax.f32 %v605_v14, 0.0  ;;  %v592_v25 = vadd.f32 %v2171_v6, %v591_v21  ;;  %v608_v26 = vadd.f32 %v2171_v6, %v607_v22 }
 0x1a2   : > { %630 = vst.msk [vmem:[#allocation2 + $0x20] sm:$0xff] %vm627_vm1, %v621_v17  ;;  %634 = vst.msk [vmem:[#allocation2 + $0x40] sm:$0xff] %vm627_vm1, %v625_v18  ;;  %v622_v27 = vmax.f32 %v600_v19, 0.0  ;;  %v626_v28 = vmax.f32 %v616_v20, 0.0 }
 0x1a3   : > { %628 = vst.msk [vmem:[#allocation2 + $0x10] sm:$0xff] %vm627_vm1, %v619_v23  ;;  %632 = vst.msk [vmem:[#allocation2 + $0x30] sm:$0xff] %vm627_vm1, %v623_v24  ;;  %v620_v29 = vmax.f32 %v592_v25, 0.0  ;;  %v624_v30 = vmax.f32 %v608_v26, 0.0 }
 0x1a4   : > { %631 = vst.msk [vmem:[#allocation2 + $0x28] sm:$0xff] %vm627_vm1, %v622_v27  ;;  %635 = vst.msk [vmem:[#allocation2 + $0x48] sm:$0xff] %vm627_vm1, %v626_v28 }
 0x1a5   : > { %629 = vst.msk [vmem:[#allocation2 + $0x18] sm:$0xff] %vm627_vm1, %v620_v29  ;;  %633 = vst.msk [vmem:[#allocation2 + $0x38] sm:$0xff] %vm627_vm1, %v624_v30 }
 0x273   : > { %v707_v36 = vpop.f32.mrb[0].mxu0 }
 0x274   : > { %v708_v37 = vadd.f32 %v2183_v35, %v707_v36  ;;  %v2335_v38 = vpop.f32.mrb[1].mxu0 }
 0x275   : > { %v710_v39 = vpop.f32.mrb[2].mxu0 }
 0x276   : > { %v714_v40 = vmax.f32 %v708_v37, 0.0  ;;  %v711_v41 = vadd.f32 %v2183_v35, %v710_v39  ;;  %v2336_v42 = vpop.f32.mrb[3].mxu0 }
 0x278   : > { %716 = vst.msk [vmem:[#allocation2] sm:$0xff] %vm627_vm1, %v714_v40  ;;  %v715_v43 = vmax.f32 %v711_v41, 0.0 }
 0x27a   : > { %717 = vst.msk [vmem:[#allocation2 + $0x8] sm:$0xff] %vm627_vm1, %v715_v43 }
 0x27b PF: > { %s3963_s9 = sld [smem:[#allocation16_spill]] }
 0x281   : > { %p2188_p9 = scmp.ne.s32.totalorder %s3963_s9, 0 }
 0x282   : > { %v2938_v44 = vmov (!%p2188_p9), 0.0  }
 0x283   : > { %721 = sbr.rel (%p2188_p9) target bundleno = 650 (0x28a), region = 76  ;;  %722 = vst.msk [vmem:[#allocation2] sm:$0xff] (!%p2188_p9), %vm627_vm1, %v2938_v44  ;;  %723 = vst.msk [vmem:[#allocation2 + $0x8] sm:$0xff] (!%p2188_p9), %vm627_vm1, %v2938_v44 }
 0x28a PF: > { %s3964_s13 = sld [smem:[#allocation16_spill]] }
 0x290   : > { %p2189_p7 = scmp.ge.s32.totalorder %s3964_s13, 3 }
 0x291   : > { %s3965_s18 = sld [smem:[#allocation29_spill]] (!%p2189_p7)  ;;  %v2939_v46 = vmov (!%p2189_p7), 0.0   ;;  %vm2940_vm3 = vmmov (!%p2189_p7), 0   ;;  %v2684_v48 = vld [vmem:[%s434_s28] sm:$0xff] (!%p2189_p7)   ;;  %s3966_s17 = sld [smem:[#allocation30_spill]] (!%p2189_p7) }
 0x292   : > { %727 = sbr.rel (%p2189_p7) target bundleno = 890 (0x37a), region = 80  ;;  %2337 = vmatprep.subr.bf16.mxu0 (!%p2189_p7), %v2939_v46  ;;  %2341 = vmatprep.mubr.msk.bf16.mxu0 (!%p2189_p7), %vm2940_vm3, %v2939_v46 }
 0x297   : > { %v2682_v45 = vld [vmem:[%s3965_s18] sm:$0xff] (!%p2189_p7)   ;;  %v2683_v47 = vld [vmem:[%s3965_s18 + $0x8] sm:$0xff] (!%p2189_p7)  }
 0x298   : > { %2338 = vmatpush3.bf16.msra.mxu0 (!%p2189_p7), %v2682_v45  ;;  %v2190_v49 = vld [vmem:[%s3966_s17] ss:$0 sm:$0xff] (!%p2189_p7) }
 0x299   : > { %2339 = vmatprep.subr.bf16.mxu0 %v2939_v46 }
 0x29c   : > { %2340 = vmatpush3.bf16.msra.mxu0 %v2683_v47 }
 0x29f   : > { %2342 = vmatmul.mubr.msk.bf16.vlgmr.msra.gmra.mrb[0].mxu0 %vm541_vm0, %v2684_v48 }
 0x372   : > { %v795_v50 = vpop.f32.mrb[0].mxu0 }
 0x373   : > { %v796_v51 = vadd.f32 %v2190_v49, %v795_v50  ;;  %v2343_v52 = vpop.f32.mrb[1].mxu0 }
 0x374   : > { %v798_v53 = vpop.f32.mrb[2].mxu0 }
 0x375   : > { %v802_v54 = vmax.f32 %v796_v51, 0.0  ;;  %v799_v55 = vadd.f32 %v2190_v49, %v798_v53  ;;  %v2344_v56 = vpop.f32.mrb[3].mxu0 }
 0x377   : > { %804 = vst.msk [vmem:[#allocation2 + $0x50] sm:$0xff] %vm627_vm1, %v802_v54  ;;  %v803_v57 = vmax.f32 %v799_v55, 0.0 }
 0x379   : > { %805 = vst.msk [vmem:[#allocation2 + $0x58] sm:$0xff] %vm627_vm1, %v803_v57 }
 0x37a PF: > { %s3967_s6 = sld [smem:[#allocation16_spill]] }
 0x380   : > { %p2195_p6 = scmp.ne.s32.totalorder %s3967_s6, 3 }
 0x381   : > { %v2941_v58 = vmov (!%p2195_p6), 0.0  }
 0x382   : > { %809 = sbr.rel (%p2195_p6) target bundleno = 905 (0x389), region = 84  ;;  %810 = vst.msk [vmem:[#allocation2 + $0x50] sm:$0xff] (!%p2195_p6), %vm627_vm1, %v2941_v58  ;;  %811 = vst.msk [vmem:[#allocation2 + $0x58] sm:$0xff] (!%p2195_p6), %vm627_vm1, %v2941_v58 }
 0x389 PF: > { %s3968_s3 = sld [smem:[#allocation31_spill]]  ;;  %vm1112_vm4 = vcmask 1043456   ;;  %v3441_v61 = vld [vmem:[#allocation2] sm:$0xff]  ;;  %v824_v62 = vlaneseq  ;;  %v3447_v1 = vld [vmem:[#allocation2 + $0x8] sm:$0xff]  ;;  %v3449_v6 = vld [vmem:[#allocation2 + $0x10] sm:$0xff]  ;;  %s3973_s29 = sld [smem:[#allocation33_spill]] }
 0x38a   : > { %v993_v7 = vrot.slane %v3441_v61, 7  ;;  %v994_v8 = vrot.slane %v3447_v1, 7  ;;  %v1091_v9 = vpack.c.bf16 %v3447_v1, %v3441_v61  ;;  %v3455_v10 = vld [vmem:[#allocation2 + $0x18] sm:$0xff]  ;;  %v995_v12 = vrot.slane %v3449_v6, 7  ;;  %v3461_v14 = vld [vmem:[#allocation2 + $0x20] sm:$0xff]  ;;  %v3463_v15 = vld [vmem:[#allocation2 + $0x28] sm:$0xff] }
 0x38b   : > { %v3457_v11 = vshrl.u32 %v824_v62, 7  ;;  %v996_v13 = vrot.slane %v3455_v10, 7  ;;  %v1049_v17 = vrot.slane %v3447_v1, 1  ;;  %v1092_v19 = vpack.c.bf16 %v3455_v10, %v3449_v6  ;;  %v3479_v23 = vld [vmem:[#allocation2 + $0x30] sm:$0xff]  ;;  %v3481_v24 = vld [vmem:[#allocation2 + $0x38] sm:$0xff]  ;;  %v3517_v37 = vld [vmem:[#allocation2 + $0x40] sm:$0xff] }
 0x38c   : > { %2347 = vmatprep.mubr.msk.bf16.mxu1 %vm627_vm1, %v1091_v9  ;;  %v1050_v21 = vrot.slane %v3449_v6, 1  ;;  %v1051_v22 = vrot.slane %v3455_v10, 1  ;;  %v1053_v27 = vrot.slane %v3463_v15, 1  ;;  %v3491_v28 = vpack.c.bf16 %v3463_v15, %v3461_v14  ;;  %v3519_v38 = vld [vmem:[#allocation2 + $0x48] sm:$0xff]  ;;  %v3521_v39 = vld [vmem:[#allocation2 + $0x58] sm:$0xff]  ;;  %s3974_s12 = sld [smem:[#allocation32_spill]] }
 0x38d   : > { %v827_v18 = vadd.s32 16, %v3457_v11  ;;  %vm1005_vm5 = vcmp.lt.s32.totalorder %v3457_v11, 1  ;;  %2387 = vmatprep.mubr.msk.bf16.mxu0 %vm627_vm1, %v1092_v19  ;;  %v997_v31 = vrot.slane %v3461_v14, 7  ;;  %v998_v32 = vrot.slane %v3463_v15, 7  ;;  %s3975_s13 = sld [smem:[#allocation34_spill]]  ;;  %s3976_s30 = sld [smem:[#allocation16_spill]] }
 0x38e   : > { %v1015_v20 = vsel %vm1005_vm5, %v994_v8, %v995_v12  ;;  %v1014_v30 = vsel %vm1005_vm5, %v995_v12, %v996_v13  ;;  %v1054_v33 = vrot.slane %v3479_v23, 1  ;;  %v1052_v35 = vrot.slane %v3461_v14, 1  ;;  %s3977_s2 = sld [smem:[#allocation17_spill]]  ;;  %s2001_s25 = sshll.u32 %s3397_s26, 4  ;;  %s3782_s25 = int_to_ptr.vmem [resolvable:$true] %s2001_s25 }
 0x38f   : > { %v2196_v59 = vld [vmem:[%s3968_s3 + $0x4] sm:$0xf]  ;;  %v2215_v60 = vld [vmem:[%s3968_s3 + $0x10] sm:$0xf]  ;;  %v2220_v16 = vld [vmem:[%s3968_s3 + $0x14] sm:$0xf]  ;;  %v3515_v36 = vpack.c.bf16 %v3481_v24, %v3479_v23  ;;  %v3545_v53 = vpack.c.bf16 %v3519_v38, %v3517_v37  ;;  %v1016_v54 = vsel %vm1005_vm5, %v993_v7, %v994_v8 }
 0x390   : > { %2513 = vmatprep.subr.msk.bf16.mxu1 %vm1112_vm4, %v2196_v59  ;;  %2517 = vmatprep.subr.msk.bf16.mxu0 %vm1112_vm4, %v2215_v60  ;;  %v1114_v63 = vsel %vm1112_vm4, %v2196_v59, 0  ;;  %v1438_v0 = vsel %vm1112_vm4, %v2215_v60, 0  ;;  %v1097_v25 = vld [vmem:[%s3968_s3] sm:$0xf]  ;;  %v855_v26 = vand.u32 15, %v827_v18  ;;  %v1519_v29 = vsel %vm1112_vm4, %v2220_v16, 0 }
 0x391   : > { %2346 = vmatpush3.bf16.msra.mxu1 %v1114_v63  ;;  %2386 = vmatpush3.bf16.msra.mxu0 %v1438_v0  ;;  %v3505_v34 = vld [vmem:[%s3968_s3 + $0x18] sm:$0xf]  ;;  %vm1060_vm7 = vcmp.lt.s32.totalorder %v3457_v11, 7  ;;  %v999_v41 = vrot.slane %v3479_v23, 7  ;;  %v1000_v42 = vrot.slane %v3481_v24, 7  ;;  %v1055_v43 = vrot.slane %v3481_v24, 1 }
 0x392   : > { %2518 = vmatprep.subr.msk.bf16.mxu0 %vm1112_vm4, %v2220_v16  ;;  %2514 = vmatprep.subr.msk.bf16.mxu1 %vm1112_vm4, %v1097_v25  ;;  %vm983_vm6 = vcmp.ge.s32.totalorder %v855_v26, 1  ;;  %v2205_v44 = vld [vmem:[%s3968_s3 + $0x8] sm:$0xf]  ;;  %v1066_v46 = vsel %vm1060_vm7, %v1053_v27, %v1054_v33  ;;  %v1056_v47 = vrot.slane %v3517_v37, 1  ;;  %v1194_v48 = vsel %vm1112_vm4, %v1097_v25, 0  ;;  %v3588_v25 = vld [vmem:[#allocation2 + $0x50] sm:$0xff] }
 0x393   : > { %v1020_v40 = vsel %vm983_vm6, %v1015_v20, 0.0  ;;  %v1057_v49 = vrot.slane %v3519_v38, 1  ;;  %v841_v50 = vand.u32 15, %v3457_v11  ;;  %v1004_v51 = vrot.slane %v3521_v39, 7  ;;  %v2210_v15 = vld [vmem:[%s3968_s3 + $0xc] sm:$0xf] }
 0x394   : > { %2348 = vmatmul.mubr.msk.bf16.vlgmr.msra.gmra.mrb[0].mxu1 %vm627_vm1, %v1092_v19  ;;  %2388 = vmatmul.mubr.msk.bf16.vlgmr.msra.gmra.mrb[0].mxu0 %vm627_vm1, %v3491_v28  ;;  %v3529_v45 = vpack.c.bf16 %v1014_v30, %v1020_v40  ;;  %v828_v52 = vadd.s32 24, %v3457_v11  ;;  %v1068_v55 = vsel %vm1060_vm7, %v1051_v22, %v1052_v35  ;;  %v830_v56 = vadd.s32 40, %v3457_v11  ;;  %s2254_s18 = sshll.u32 %s3976_s30, 3  ;;  %s2249_s5 = sshll.u32 %s3977_s2, 5 }
 0x395   : > { %2351 = vmatprep.mubr.msk.bf16.mxu1 %vm627_vm1, %v3491_v28  ;;  %2396 = vmatpush3.bf16.msra.mxu0 %v1519_v29  ;;  %vm981_vm8 = vcmp.ge.s32.totalorder %v841_v50, 1  ;;  %v1017_v57 = vsel %vm1005_vm5, %v1004_v51, %v993_v7  ;;  %v1069_v59 = vsel %vm1060_vm7, %v1050_v21, %v1051_v22  ;;  %v1067_v63 = vsel %vm1060_vm7, %v1052_v35, %v1053_v27  ;;  %s1998_s24 = sadd.s32 %s2254_s18, %s2249_s5  ;;  %s3978_s28 = sld [smem:[#allocation35_spill]] }
 0x396   : > { %2391 = vmatprep.mubr.msk.bf16.mxu0 %vm627_vm1, %v3515_v36  ;;  %2519 = vmatprep.subr.msk.bf16.mxu0 %vm1112_vm4, %v3505_v34  ;;  %v862_v58 = vand.u32 15, %v828_v52  ;;  %v1018_v60 = vsel %vm981_vm8, %v1017_v57, 0.0  ;;  %v876_v62 = vand.u32 15, %v830_v56  ;;  %v829_v0 = vadd.s32 32, %v3457_v11  ;;  %v2230_v57 = vld [vmem:[%s3968_s3 + $0x1c] sm:$0xf] }
 0x397   : > { %2356 = vmatpush3.bf16.msra.mxu1 %v1194_v48  ;;  %v1030_v8 = vpack.c.bf16 %v1016_v54, %v1018_v60  ;;  %v1012_v7 = vsel %vm1005_vm5, %v997_v31, %v998_v32  ;;  %v832_v9 = vadd.s32 56, %v3457_v11  ;;  %v1013_v16 = vsel %vm1005_vm5, %v996_v13, %v997_v31  ;;  %s2250_s20 = sshll.u32 %s1998_s24, 7  ;;  %s2775_s4 = scalar_lea.vmem %s3782_s25, 1024 }
 0x398   : > { %2515 = vmatprep.subr.msk.bf16.mxu1 %vm1112_vm4, %v2205_v44  ;;  %vm1039_vm9 = vcmp.le.s32.totalorder %v862_v58, 14  ;;  %vm1041_vm10 = vcmp.le.s32.totalorder %v876_v62, 14  ;;  %v869_v14 = vand.u32 15, %v829_v0  ;;  %v1064_v22 = vsel %vm1060_vm7, %v1055_v43, %v1056_v47  ;;  %p2776_p4 = scmp.ne.s32.totalorder %s3782_s25, %s2775_s4  ;;  %p3979_p0 = scmp.ne.s32.totalorder %s3936_s8, 0 }
 0x399   : > { %v1076_v12 = vsel %vm1039_vm9, %v1068_v55, 0.0  ;;  %v1078_v19 = vsel %vm1041_vm10, %v1066_v46, 0.0  ;;  %v890_v20 = vand.u32 15, %v832_v9  ;;  %v1065_v10 = vsel %vm1060_vm7, %v1054_v33, %v1055_v43  ;;  %s2942_s23 = smov [#allocation9]  }
 0x39a   : > { %v3582_v18 = vpack.c.bf16 %v1076_v12, %v1069_v59  ;;  %v3590_v26 = vpack.c.bf16 %v1078_v19, %v1067_v63  ;;  %vm985_vm11 = vcmp.ge.s32.totalorder %v869_v14, 1  ;;  %v831_v13 = vadd.s32 48, %v3457_v11  ;;  %p2777_p12 = pnand %p2776_p4, %p3979_p0 }
 0x39b   : > { %v1022_v27 = vsel %vm985_vm11, %v1013_v16, 0.0  ;;  %vm1043_vm12 = vcmp.le.s32.totalorder %v890_v20, 14  ;;  %v1011_v29 = vsel %vm1005_vm5, %v998_v32, %v999_v41  ;;  %v834_v30 = vadd.s32 72, %v3457_v11  ;;  %v2235_v16 = vld [vmem:[%s3968_s3 + $0x20] sm:$0xf]  ;;  %s3780_s19 = scalar_lea.hbm %s3978_s28, %s2250_s20 }
 0x39c   : > { %2352 = vmatmul.mubr.msk.bf16.gmra.mrb[4].mxu1 %vm627_vm1, %v3515_v36  ;;  %2392 = vmatmul.mubr.msk.bf16.gmra.mrb[4].mxu0 %vm627_vm1, %v3545_v53  ;;  %v3604_v31 = vpack.c.bf16 %v1012_v7, %v1022_v27  ;;  %v1080_v35 = vsel %vm1043_vm12, %v1064_v22, 0.0  ;;  %v883_v33 = vand.u32 15, %v831_v13  ;;  %v1058_v40 = vrot.slane %v3588_v25, 1  ;;  %p2778_p11 = pneg %p2777_p12 }
 0x39d   : > { %2357 = vmatprep.mubr.msk.bf16.mxu1 %vm627_vm1, %v1030_v8  ;;  %2397 = vmatprep.mubr.msk.bf16.mxu0 %vm627_vm1, %v3582_v18  ;;  %v1048_v43 = vrot.slane %v3441_v61, 1  ;;  %v3608_v46 = vpack.c.bf16 %v1080_v35, %v1065_v10  ;;  %v904_v48 = vand.u32 15, %v834_v30  ;;  %v1276_v50 = vsel %vm1112_vm4, %v2205_v44, 0  ;;  %v1864_v61 = vld [vmem:[%s3973_s29] sm:$0xf]  ;;  %s1985_s29 = scalar_lea.sflag [#allocation5], %s3336_s7 }
 0x39e   : > { %v1600_v32 = vsel %vm1112_vm4, %v3505_v34, 0  ;;  %vm3618_vm13 = vcmp.ge.s32.totalorder %v883_v33, 1  ;;  %v1062_v44 = vsel %vm1060_vm7, %v1057_v49, %v1058_v40  ;;  %v826_v54 = vadd.s32 8, %v3457_v11 }
 0x39f   : > { %v1010_v34 = vsel %vm1005_vm5, %v999_v41, %v1000_v42  ;;  %v1024_v55 = vsel %vm3618_vm13, %v1011_v29, 0.0  ;;  %vm3639_vm14 = vcmp.le.s32.totalorder %v904_v48, 14  ;;  %v1070_v23 = vsel %vm1060_vm7, %v1049_v17, %v1050_v21 }
 0x3a0   : > { %v848_v58 = vand.u32 15, %v826_v54  ;;  %v833_v41 = vadd.s32 64, %v3457_v11  ;;  %v1063_v6 = vsel %vm1060_vm7, %v1056_v47, %v1057_v49  ;;  %v1082_v59 = vsel %vm3639_vm14, %v1062_v44, 0.0 }
 0x3a1   : > { %v1071_v21 = vsel %vm1060_vm7, %v1048_v43, %v1049_v17  ;;  %v1033_v60 = vpack.c.bf16 %v1010_v34, %v1024_v55  ;;  %v1001_v62 = vrot.slane %v3517_v37, 7  ;;  %v1089_v8 = vpack.c.bf16 %v1082_v59, %v1063_v6 }
 0x3a2   : > { %vm1037_vm15 = vcmp.le.s32.totalorder %v848_v58, 14  ;;  %v897_v0 = vand.u32 15, %v833_v41  ;;  %v1002_v49 = vrot.slane %v3519_v38, 7  ;;  %v835_v1 = vadd.s32 80, %v3457_v11 }
 0x3a3   : > { %v1074_v63 = vsel %vm1037_vm15, %v1070_v23, 0.0  ;;  %v1009_v17 = vsel %vm1005_vm5, %v1000_v42, %v1001_v62  ;;  %v1003_v9 = vrot.slane %v3588_v25, 7  ;;  %v1357_v12 = vsel %vm1112_vm4, %v2210_v15, 0 }
 0x3a4   : > { %2358 = vmatmul.mubr.msk.bf16.vlgmr.msra.gmra.mrb[0].mxu1 %vm627_vm1, %v3529_v45  ;;  %2398 = vmatmul.mubr.msk.bf16.vlgmr.msra.gmra.mrb[0].mxu0 %vm627_vm1, %v3590_v26  ;;  %v1085_v47 = vpack.c.bf16 %v1074_v63, %v1071_v21  ;;  %vm989_vm2 = vcmp.ge.s32.totalorder %v897_v0, 1  ;;  %v1008_v37 = vsel %vm1005_vm5, %v1001_v62, %v1002_v49  ;;  %v911_v7 = vand.u32 15, %v835_v1 }
 0x3a5   : > { %2361 = vmatprep.mubr.msk.bf16.mxu1 %vm627_vm1, %v3604_v31  ;;  %2366 = vmatpush3.bf16.msra.mxu1 %v1276_v50  ;;  %v1026_v38 = vsel %vm989_vm2, %v1009_v17, 0.0  ;;  %v1681_v24 = vsel %vm1112_vm4, %v2230_v57, 0  ;;  %v1007_v42 = vsel %vm1005_vm5, %v1002_v49, %v1003_v9  ;;  %v1059_v10 = vrot.slane %v3521_v39, 1 }
 0x3a6   : > { %2516 = vmatprep.subr.msk.bf16.mxu1 %vm1112_vm4, %v2210_v15  ;;  %2406 = vmatpush3.bf16.msra.mxu0 %v1600_v32  ;;  %v1034_v14 = vpack.c.bf16 %v1008_v37, %v1026_v38  ;;  %vm991_vm3 = vcmp.ge.s32.totalorder %v911_v7, 1 }
 0x3a7   : > { %2401 = vmatprep.mubr.msk.bf16.mxu0 %vm627_vm1, %v3608_v46  ;;  %2520 = vmatprep.subr.msk.bf16.mxu0 %vm1112_vm4, %v2230_v57  ;;  %v1028_v19 = vsel %vm991_vm3, %v1007_v42, 0.0 }
 0x3ac   : > { %2362 = vmatmul.mubr.msk.bf16.gmra.mrb[4].mxu1 %vm627_vm1, %v1033_v60  ;;  %2402 = vmatmul.mubr.msk.bf16.gmra.mrb[4].mxu0 %vm627_vm1, %v1089_v8 }
 0x3ad   : > { %2367 = vmatprep.mubr.msk.bf16.mxu1 %vm627_vm1, %v1085_v47  ;;  %2407 = vmatprep.mubr.msk.bf16.mxu0 %vm627_vm1, %v3604_v31 }
 0x3b4   : > { %2368 = vmatmul.mubr.msk.bf16.vlgmr.msra.gmra.mrb[0].mxu1 %vm627_vm1, %v3582_v18  ;;  %2408 = vmatmul.mubr.msk.bf16.vlgmr.msra.gmra.mrb[0].mxu0 %vm627_vm1, %v1033_v60  ;;  %v1006_v18 = vsel %vm1005_vm5, %v1003_v9, %v1004_v51  ;;  %v1762_v51 = vsel %vm1112_vm4, %v2235_v16, 0 }
 0x3b5   : > { %2371 = vmatprep.mubr.msk.bf16.mxu1 %vm627_vm1, %v3590_v26  ;;  %2376 = vmatpush3.bf16.msra.mxu1 %v1357_v12  ;;  %v1035_v20 = vpack.c.bf16 %v1006_v18, %v1028_v19  ;;  %v1954_v18 = vunpack.c.l.bf16 %v3372_v4 }
 0x3b6   : > { %2416 = vmatpush3.bf16.msra.mxu0 %v1681_v24  ;;  %2411 = vmatprep.mubr.msk.bf16.mxu0 %vm627_vm1, %v1034_v14 }
 0x3b7   : > { %2521 = vmatprep.subr.msk.bf16.mxu0 %vm1112_vm4, %v2235_v16  ;;  %2522 = vmatprep.subr.msk.bf16.mxu1 %vm1112_vm4, %v1864_v61  ;;  %v2241_v16 = vld [vmem:[%s3975_s13] ss:$0 sm:$0xff] }
 0x3bc   : > { %2372 = vmatmul.mubr.msk.bf16.gmra.mrb[4].mxu1 %vm627_vm1, %v3608_v46  ;;  %2412 = vmatmul.mubr.msk.bf16.gmra.mrb[4].mxu0 %vm627_vm1, %v1035_v20  ;;  %v1952_v20 = vunpack.c.l.bf16 %v3368_v2 }
 0x3bd   : > { %2377 = vmatprep.mubr.msk.bf16.mxu1 %vm627_vm1, %v3529_v45  ;;  %2417 = vmatprep.mubr.msk.bf16.mxu0 %vm627_vm1, %v3491_v28  ;;  %v1096_v45 = vpack.c.bf16 %v3521_v39, %v3588_v25  ;;  %v836_v28 = vadd.s32 88, %v3457_v11  ;;  %v1885_v39 = vsel %vm1112_vm4, %v1864_v61, 0 }
 0x3bf   : > { %v918_v22 = vand.u32 15, %v836_v28  ;;  %v1955_v28 = vunpack.c.h.bf16 %v3372_v4 }
 0x3c1   : > { %vm1047_vm5 = vcmp.le.s32.totalorder %v918_v22, 14 }
 0x3c4   : > { %2378 = vmatmul.mubr.msk.bf16.vlgmr.msra.gmra.mrb[0].mxu1 %vm627_vm1, %v3604_v31  ;;  %2418 = vmatmul.mubr.msk.bf16.vlgmr.msra.gmra.mrb[0].mxu0 %vm627_vm1, %v3515_v36  ;;  %v1072_v36 = vsel %vm1060_vm7, %v1059_v10, %v1048_v43  ;;  %v2240_v43 = vld [vmem:[%s3974_s12] ss:$0 sm:$0xff]  ;;  %s2779_s12 = sshll.u32 %s2942_s23, 4  ;;  %s2780_s12 = int_to_ptr.vmem [resolvable:$false] %s2779_s12 }
 0x3c5   : > { %2381 = vmatprep.mubr.msk.bf16.mxu1 %vm627_vm1, %v1033_v60  ;;  %2426 = vmatpush3.bf16.msra.mxu0 %v1762_v51  ;;  %s2781_s21 = scalar_lea.vmem %s2780_s12, 2048  ;;  %p2782_p2 = scmp.lt.s32.totalorder %s3782_s25, %s2780_s12 }
 0x3c6   : > { %2421 = vmatprep.mubr.msk.bf16.mxu0 %vm627_vm1, %v3545_v53  ;;  %v1061_v53 = vsel %vm1060_vm7, %v1058_v40, %v1059_v10  ;;  %2436 = vmatpush3.bf16.msra.mxu1 %v1885_v39  ;;  %p2783_p1 = scmp.lt.s32.totalorder %s2781_s21, %s2775_s4 }
 0x3c8   : > { %p2784_p5 = por %p2783_p1, %p2782_p2 }
 0x3ca   : > { %p2785_p8 = pnand %p2784_p5, %p2778_p11 }
 0x3cc   : > { %2382 = vmatmul.mubr.msk.bf16.gmra.mrb[4].mxu1 %vm627_vm1, %v1034_v14  ;;  %2422 = vmatmul.mubr.msk.bf16.gmra.mrb[4].mxu0 %vm627_vm1, %v1096_v45 }
 0x3cd   : > { %2427 = vmatprep.mubr.msk.bf16.mxu0 %vm627_vm1, %v3590_v26  ;;  %v1084_v26 = vsel %vm1047_vm5, %v1072_v36, 0.0  ;;  %v1953_v36 = vunpack.c.h.bf16 %v3368_v2 }
 0x3ce   : > { %v1090_v13 = vpack.c.bf16 %v1084_v26, %v1061_v53 }
 0x3d4   : > { %2428 = vmatmul.mubr.msk.bf16.vlgmr.msra.gmra.mrb[0].mxu0 %vm627_vm1, %v3608_v46 }
 0x3d5   : > { %2431 = vmatprep.mubr.msk.bf16.mxu0 %vm627_vm1, %v1089_v8 }
 0x3dc   : > { %2432 = vmatmul.mubr.msk.bf16.gmra.mrb[4].mxu0 %vm627_vm1, %v1090_v13 }
 0x497   : > { %v2379_v27 = vpop.f32.mrb[0].mxu1 }
 0x498   : > { %v1393_v29 = vpop.f32.mrb[1].mxu1 }
 0x499   : > { %v2380_v30 = vpop.f32.mrb[2].mxu1 }
 0x49a   : > { %v1396_v25 = vpop.f32.mrb[3].mxu1 }
 0x49f   : > { %v2383_v31 = vpop.f32.mrb[4].mxu1 }
 0x4a0   : > { %v1409_v11 = vpop.f32.mrb[5].mxu1 }
 0x4a1   : > { %v2384_v35 = vpop.f32.mrb[6].mxu1 }
 0x4a2   : > { %v1412_v33 = vpop.f32.mrb[7].mxu1 }
 0x4a7   : > { %v2429_v40 = vpop.f32.mrb[0].mxu0 }
 0x4a8   : > { %v2449_v46 = vadd.f32 %v2429_v40, %v2379_v27  ;;  %v1798_v48 = vpop.f32.mrb[1].mxu0 }
 0x4a9   : > { %v2450_v50 = vadd.f32 %v1798_v48, %v1393_v29  ;;  %v2430_v15 = vpop.f32.mrb[2].mxu0 }
 0x4aa   : > { %v1846_v32 = vadd.f32 %v2449_v46, %v2240_v43  ;;  %v2451_v52 = vadd.f32 %v2430_v15, %v2380_v30  ;;  %v1801_v44 = vpop.f32.mrb[3].mxu0 }
 0x4ab   : > { %v1844_v54 = vadd.f32 %v2450_v50, %v2240_v43  ;;  %v2452_v34 = vadd.f32 %v1801_v44, %v1396_v25  ;;  %v1957_v50 = vunpack.c.h.bf16 %v3370_v3 }
 0x4ac   : > { %v1847_v55 = vadd.f32 %v2451_v52, %v2240_v43  ;;  %v1854_v57 = vmax.f32 %v1846_v32, 0.0 }
 0x4ad   : > { %v1845_v56 = vadd.f32 %v2452_v34, %v2240_v43  ;;  %v1852_v23 = vmax.f32 %v1844_v54, 0.0 }
 0x4ae   : > { %v1855_v58 = vmax.f32 %v1847_v55, 0.0 }
 0x4af   : > { %v1853_v41 = vmax.f32 %v1845_v56, 0.0  ;;  %v2433_v6 = vpop.f32.mrb[4].mxu0 }
 0x4b0   : > { %v1861_v59 = vpack.c.bf16 %v1855_v58, %v1854_v57  ;;  %v2453_v21 = vadd.f32 %v2433_v6, %v2383_v31  ;;  %v1814_v60 = vpop.f32.mrb[5].mxu0  ;;  %v1958_v31 = vunpack.c.l.bf16 %v3374_v5 }
 0x4b1   : > { %v2454_v62 = vadd.f32 %v1814_v60, %v1409_v11  ;;  %v2434_v63 = vpop.f32.mrb[6].mxu0  ;;  %v1860_v0 = vpack.c.bf16 %v1853_v41, %v1852_v23 }
 0x4b2   : > { %v1850_v8 = vadd.f32 %v2453_v21, %v2240_v43  ;;  %v2455_v47 = vadd.f32 %v2434_v63, %v2384_v35  ;;  %v1817_v49 = vpop.f32.mrb[7].mxu0  ;;  %v1956_v35 = vunpack.c.l.bf16 %v3370_v3 }
 0x4b3   : > { %v1848_v1 = vadd.f32 %v2454_v62, %v2240_v43  ;;  %v2456_v17 = vadd.f32 %v1817_v49, %v1412_v33  ;;  %2437 = vmatprep.mubr.msk.bf16.mxu1 %vm627_vm1, %v1860_v0 }
 0x4b4   : > { %v1851_v37 = vadd.f32 %v2455_v47, %v2240_v43  ;;  %2438 = vmatmul.mubr.msk.bf16.vlgmr.msra.gmra.mrb[8].mxu1 %vm627_vm1, %v1861_v59  ;;  %v1858_v7 = vmax.f32 %v1850_v8, 0.0 }
 0x4b5   : > { %v1849_v38 = vadd.f32 %v2456_v17, %v2240_v43  ;;  %v1856_v12 = vmax.f32 %v1848_v1, 0.0  ;;  %v1959_v43 = vunpack.c.h.bf16 %v3374_v5 }
 0x4b6   : > { %v1859_v9 = vmax.f32 %v1851_v37, 0.0 }
 0x4b7   : > { %v1857_v14 = vmax.f32 %v1849_v38, 0.0 }
 0x4b8   : > { %v1863_v24 = vpack.c.bf16 %v1859_v9, %v1858_v7 }
 0x4b9   : > { %v1862_v42 = vpack.c.bf16 %v1857_v14, %v1856_v12 }
 0x4bb   : > { %2441 = vmatprep.mubr.msk.bf16.mxu1 %vm627_vm1, %v1862_v42 }
 0x4bc   : > { %2442 = vmatmul.mubr.msk.bf16.gmra.mrb[12].mxu1 %vm627_vm1, %v1863_v24 }
 0x587   : > { %v2439_v19 = vpop.f32.mrb[8].mxu1 }
 0x588   : > { %v1930_v51 = vadd.f32 %v2439_v19, %v2241_v16  ;;  %v1921_v45 = vpop.f32.mrb[9].mxu1 }
 0x589   : > { %v1922_v22 = vadd.f32 %v2241_v16, %v1921_v45  ;;  %v2440_v10 = vpop.f32.mrb[10].mxu1 }
 0x58a   : > { %v1962_v53 = vadd.f32 %v1954_v18, %v1930_v51  ;;  %v1933_v26 = vadd.f32 %v2440_v10, %v2241_v16  ;;  %v1924_v13 = vpop.f32.mrb[11].mxu1 }
 0x58b   : > { %v1960_v61 = vadd.f32 %v1952_v20, %v1922_v22  ;;  %v1925_v39 = vadd.f32 %v2241_v16, %v1924_v13 }
 0x58c   : > { %v1970_v27 = vmax.f32 %v1962_v53, 0.0  ;;  %v1963_v29 = vadd.f32 %v1955_v28, %v1933_v26 }
 0x58d   : > { %v1968_v30 = vmax.f32 %v1960_v61, 0.0  ;;  %v1961_v25 = vadd.f32 %v1953_v36, %v1925_v39 }
 0x58e   : > { %1978 = vst.msk [vmem:[%s3397_s26 + $0x10] sm:$0xff] %vm541_vm0, %v1970_v27  ;;  %v1971_v4 = vmax.f32 %v1963_v29, 0.0 }
 0x58f   : > { %1976 = vst.msk [vmem:[%s3397_s26] sm:$0xff] %vm541_vm0, %v1968_v30  ;;  %v1969_v2 = vmax.f32 %v1961_v25, 0.0  ;;  %v2443_v11 = vpop.f32.mrb[12].mxu1 }
 0x590   : > { %1979 = vst.msk [vmem:[%s3397_s26 + $0x18] sm:$0xff] %vm541_vm0, %v1971_v4  ;;  %v1946_v33 = vadd.f32 %v2443_v11, %v2241_v16  ;;  %v1937_v40 = vpop.f32.mrb[13].mxu1 }
 0x591   : > { %1977 = vst.msk [vmem:[%s3397_s26 + $0x8] sm:$0xff] %vm541_vm0, %v1969_v2  ;;  %v1938_v46 = vadd.f32 %v2241_v16, %v1937_v40  ;;  %v2444_v48 = vpop.f32.mrb[14].mxu1 }
 0x592   : > { %v1966_v15 = vadd.f32 %v1958_v31, %v1946_v33  ;;  %v1949_v32 = vadd.f32 %v2444_v48, %v2241_v16  ;;  %v1940_v52 = vpop.f32.mrb[15].mxu1 }
 0x593   : > { %v1964_v44 = vadd.f32 %v1956_v35, %v1938_v46  ;;  %v1941_v54 = vadd.f32 %v2241_v16, %v1940_v52 }
 0x594   : > { %v1974_v5 = vmax.f32 %v1966_v15, 0.0  ;;  %v1967_v34 = vadd.f32 %v1959_v43, %v1949_v32 }
 0x595   : > { %v1972_v55 = vmax.f32 %v1964_v44, 0.0  ;;  %v1965_v56 = vadd.f32 %v1957_v50, %v1941_v54 }
 0x596   : > { %1982 = vst.msk [vmem:[%s3397_s26 + $0x30] sm:$0xff] %vm541_vm0, %v1974_v5  ;;  %v1975_v57 = vmax.f32 %v1967_v34, 0.0 }
 0x597   : > { %1980 = vst.msk [vmem:[%s3397_s26 + $0x20] sm:$0xff] %vm541_vm0, %v1972_v55  ;;  %v1973_v3 = vmax.f32 %v1965_v56, 0.0 }
 0x598   : > { %1983 = vst.msk [vmem:[%s3397_s26 + $0x38] sm:$0xff] %vm541_vm0, %v1975_v57 }
 0x599   : > { %1981 = vst.msk [vmem:[%s3397_s26 + $0x28] sm:$0xff] %vm541_vm0, %v1973_v3 }
 0x59a   : > { %2788 = shalt.err (!%p2785_p8)
}
 0x59b   : > { %s2789_s26 = scalar_lea.hbm %s3780_s19, 1024  ;;  %s2793_s30 = scalar_lea.hbm %s3978_s28, 8192 }
 0x59c   : > { %p2790_p13 = scmp.ne.s32.totalorder %s3780_s19, %s2789_s26  ;;  %p2794_p9 = scmp.lt.u32.totalorder %s3780_s19, %s3978_s28 }
 0x59d   : > { %p2795_p7 = scmp.lt.u32.totalorder %s2793_s30, %s2789_s26  ;;  %p2797_p4 = scmp.lt.u32.totalorder %s2789_s26, %s3780_s19 }
 0x59e   : > { %p2791_p10 = pnand %p2790_p13, %p3979_p0 }
 0x59f   : > { %p2796_p6 = por %p2795_p7, %p2794_p9 }
 0x5a0   : > { %p2792_p3 = pneg %p2791_p10 }
 0x5a1   : > { %p2798_p12 = por %p2797_p4, %p2796_p6 }
 0x5a3   : > { %p2799_p11 = pnand %p2798_p12, %p2792_p3 }
 0x5a5   : > { %2802 = shalt.err (!%p2799_p11)
}
 0x5a6   : > { %s2943_s5 = smov 128   ;;  %s2944_s24 = smov 8  }
 0x5a7   : > { %2529 = dma.vmem_to_hbm [thread:$0]  (%p3979_p0), %s3782_s25, 1024, %s3780_s19, %s1985_s29, %s2943_s5, %s2943_s5, %s2944_s24  }
 0x5a8 PF: > { %p2546_p2 = scmp.ge.s32.totalorder %s2929_s22, 2  ;;  %s2016_s20 = sand.u32 1, %s2901_s15  }
 0x5a9   : > { %p3980_p1 = scmp.ne.s32.totalorder %s3937_s27, 0  ;;  %s2017_s17 = scalar_lea.sflag [#allocation5], %s2016_s20 }
 0x5ab   : > { %p2542_p5 = pnand %p2546_p2, %p3980_p1 }
 0x5ad   : > { %2872 = dma.done.wait (!%p2542_p5), %s2017_s17, 1024  }
 0x5ae   : > { %2874 = vsyncadd (!%p2542_p5), %s2017_s17, 4294966272  ;;  %s28_s22 = sadd.s32 1, %s2929_s22   ;;  %s3982_s12 = sld [smem:[#allocation14_spill]] }
 0x5af   : > { %p3819_p8 = scmp.ge.s32.totalorder %s28_s22, 10   ;;  %s3983_s8 = sld [smem:[#allocation24_spill]] }
 0x5b0   : > { %s3984_s7 = sld [smem:[#allocation15_spill]]  ;;  %s3985_s17 = sld [smem:[#allocation25_spill]] }
 0x5b1   : > { %s3986_s18 = sld [smem:[#allocation18_spill]]  ;;  %s3987_s19 = sld [smem:[#allocation19_spill]] }
 0x5b2   : > { %s3988_s20 = sld [smem:[#allocation20_spill]]  ;;  %s3989_s21 = sld [smem:[#allocation21_spill]] }
 0x5b3   : > { %s3990_s30 = smov %s2881_s10  ;;  %s3991_s10 = smov %s2885_s11 }
 0x5b4   : > { %s3992_s11 = smov %s3286_s1  ;;  %s3993_s13 = smov %s2897_s14 }
 0x5b5   : > { %s3994_s14 = smov %s3983_s8  ;;  %s3995_s15 = smov %s2905_s16 }
 0x5b6   : > { %s3996_s16 = smov %s3984_s7  ;;  %27 = sbr.rel (!%p3819_p8) target bundleno = 23 (0x17), region = 149 }
 0x5bd   :  { %2022 = vsyncpa [#allocation4], 1 }
 0x5be   :  { %2024 = vsyncpa [#allocation4 + $0x1], 1 }
 0x5bf   :  { %2025 = vsyncpa [#allocation7], 1 }
 0x5c0   :  { %2027 = vsyncpa [#allocation7 + $0x1], 1 }
 0x5c1   :  { %2028 = vsyncpa [#allocation5], 1 }
 0x5c2   :  { %2030 = vsyncpa [#allocation5 + $0x1], 1 }

</bundles_post_ra>
